<compile_context>
chip_gen: v7x
topology: tpu7x:2x2x1
jax: 0.10.0
libtpu: 0.0.40
codegen_flags: <defaults>
</compile_context>

<pallas_src>
import jax
import jax.numpy as jnp
from jax.experimental import pallas as pl
from jax.experimental.pallas import tpu as pltpu


def _const_spec(arr):
    """BlockSpec for a weight that stays VMEM-resident (constant block index)."""
    nd = arr.ndim
    return pl.BlockSpec(arr.shape, lambda bi, ti, _nd=nd: (0,) * _nd)


def _make_kernel(num_layers, tb, t_chunk, hidden):
    """Per-(batch-block, time-chunk) GRU + Linear kernel."""
    H = hidden
    unroll = True if t_chunk <= 16 else 8

    def kernel(*refs):
        # refs = [x_ref,
        #         (w_ih, w_hh, b_gi, b_hn) * num_layers,
        #         w_lin, b_lin,
        #         out_ref,
        #         h_ref, gi_ref, seq_ref]
        x_ref = refs[0]
        idx = 1
        layer_refs = []
        for _ in range(num_layers):
            layer_refs.append(refs[idx:idx + 4])
            idx += 4
        w_lin_ref = refs[idx]
        b_lin_ref = refs[idx + 1]
        out_ref = refs[idx + 2]
        h_ref = refs[idx + 3]     # (L, TB, H)   f32  — persists across time chunks
        gi_ref = refs[idx + 4]    # (T, TB, 3H)  f32  — chunk input-path gates
        seq_ref = refs[idx + 5]   # (T, TB, H)   bf16 — current layer's chunk outputs

        # New batch block starts from a fresh hidden state (h0 = zeros).
        @pl.when(pl.program_id(1) == 0)
        def _():
            h_ref[...] = jnp.zeros_like(h_ref)

        for l, (w_ih_ref, w_hh_ref, b_gi_ref, b_hn_ref) in enumerate(layer_refs):
            w_ih = w_ih_ref[...]                                   # (In_l, 3H) bf16
            w_hh = w_hh_ref[...]                                   # (H, 3H)    bf16
            b_gi = b_gi_ref[...]                                   # (1, 3H)    f32
            b_hn = jnp.broadcast_to(b_hn_ref[...], (tb, H))        # hoisted

            # ---- input-path gates for the WHOLE chunk: one fused matmul ----
            if l == 0:
                # Batch-major HBM block -> flattened M dim, then scatter into the
                # time-major gate scratch (the only input-side relayout).
                x_flat = x_ref[...].astype(jnp.bfloat16).reshape(tb * t_chunk, -1)
                gi = jnp.dot(x_flat, w_ih,
                             preferred_element_type=jnp.float32) + b_gi
                gi = gi.reshape(tb, t_chunk, 3 * H)
                for b in range(tb):
                    gi_ref[:, b, :] = gi[b]
            else:
                # seq scratch is already time-major: flatten + single matmul.
                xin = seq_ref[...].reshape(t_chunk * tb, H)
                gi_ref[...] = (jnp.dot(xin, w_ih,
                                       preferred_element_type=jnp.float32)
                               + b_gi).reshape(t_chunk, tb, 3 * H)

            # ---- serial recurrence: only the h-dependent matmul per timestep ----
            def step(t, h):                                        # h: (TB, H) f32
                gi_t = gi_ref[t]                                   # (TB, 3H)
                gh = jnp.dot(h.astype(jnp.bfloat16), w_hh,
                             preferred_element_type=jnp.float32)   # (TB, 3H)
                r = jax.nn.sigmoid(gi_t[:, :H] + gh[:, :H])
                z = jax.nn.sigmoid(gi_t[:, H:2 * H] + gh[:, H:2 * H])
                n = jnp.tanh(gi_t[:, 2 * H:] + r * (gh[:, 2 * H:] + b_hn))
                h_new = (1.0 - z) * n + z * h
                seq_ref[t] = h_new.astype(seq_ref.dtype)           # feed next layer
                return h_new

            h_ref[l] = jax.lax.fori_loop(0, t_chunk, step, h_ref[l], unroll=unroll)

        # ---- Linear head: one fused matmul over the flattened chunk ----
        w_lin = w_lin_ref[...]                                     # (H, Fout) bf16
        b_lin = b_lin_ref[...]                                     # (1, Fout) f32
        y = seq_ref[...].reshape(t_chunk * tb, H)
        o = jnp.dot(y, w_lin, preferred_element_type=jnp.float32) + b_lin
        o = o.reshape(t_chunk, tb, -1)
        for b in range(tb):                                        # time-major ->
            out_ref[b] = o[:, b, :].astype(out_ref.dtype)          # batch-major out

    return kernel


def rnn_hist_gen_forward(x, params, *, t_chunk=None, batch_block=None):
    """x: (B, S, noise_vector_size) f32 -> (B, S, gen_features_out) f32."""
    B, S, In = x.shape
    layers = params["layers"]
    L = len(layers)
    H = layers[0]["w_hh"].shape[0]
    Fout = params["w_lin"].shape[1]

    T = S if t_chunk is None else t_chunk
    assert S % T == 0 and (T == S or T % 8 == 0), "t_chunk must divide S (mult of 8)"
    TB = B if batch_block is None else batch_block
    assert B % TB == 0, "batch_block must divide B"

    inputs = [x]
    in_specs = [pl.BlockSpec((TB, T, In), lambda bi, ti: (bi, ti, 0))]

    for lp in layers:
        w_ih = lp["w_ih"].astype(jnp.bfloat16)                     # (In_l, 3H)
        w_hh = lp["w_hh"].astype(jnp.bfloat16)                     # (H, 3H)
        b_ih, b_hh = lp["b_ih"], lp["b_hh"]                        # (3H,), (3H,)
        # Fold b_hh for the r,z gates into the chunk-level input-gate bias; the
        # n gate's b_hn must stay inside r*(W_hn h + b_hn) per PyTorch GRU.
        b_gi = (b_ih + jnp.concatenate(
            [b_hh[:2 * H], jnp.zeros((H,), b_hh.dtype)]))[None, :]  # (1, 3H) f32
        b_hn = b_hh[2 * H:][None, :]                                # (1, H)  f32
        for arr in (w_ih, w_hh, b_gi, b_hn):
            inputs.append(arr)
            in_specs.append(_const_spec(arr))

    w_lin = params["w_lin"].astype(jnp.bfloat16)                    # (H, Fout)
    b_lin = params["b_lin"][None, :]                                # (1, Fout) f32
    for arr in (w_lin, b_lin):
        inputs.append(arr)
        in_specs.append(_const_spec(arr))

    out = pl.pallas_call(
        _make_kernel(L, TB, T, H),
        out_shape=jax.ShapeDtypeStruct((B, S, Fout), jnp.float32),
        grid_spec=pltpu.PrefetchScalarGridSpec(
            num_scalar_prefetch=0,
            grid=(B // TB, S // T),
            in_specs=in_specs,
            out_specs=pl.BlockSpec((TB, T, Fout), lambda bi, ti: (bi, ti, 0)),
            scratch_shapes=[
                pltpu.VMEM((L, TB, H), jnp.float32),       # hidden-state carry
                pltpu.VMEM((T, TB, 3 * H), jnp.float32),   # chunk input-path gates
                pltpu.VMEM((T, TB, H), jnp.bfloat16),      # chunk layer outputs
            ],
        ),
        compiler_params=pltpu.CompilerParams(
            dimension_semantics=("parallel", "arbitrary")),
    )(*inputs)
    return out


def init_params(key, noise_vector_size, rnn_layers, rnn_hidden_size, gen_features_out):
    """Gate-fused GRU params (gate order r,z,n) + Linear head, f32 master copies.

    w_ih[l]: (in_l, 3H), w_hh[l]: (H, 3H), b_ih[l]/b_hh[l]: (3H,)
    w_lin: (H, Fout), b_lin: (Fout,)
    """
    H = rnn_hidden_size
    bound = 1.0 / float(H) ** 0.5
    layers = []
    for l in range(rnn_layers):
        in_l = noise_vector_size if l == 0 else H
        key, k1, k2, k3, k4 = jax.random.split(key, 5)
        layers.append(dict(
            w_ih=jax.random.uniform(k1, (in_l, 3 * H), jnp.float32, -bound, bound),
            w_hh=jax.random.uniform(k2, (H, 3 * H), jnp.float32, -bound, bound),
            b_ih=jax.random.uniform(k3, (3 * H,), jnp.float32, -bound, bound),
            b_hh=jax.random.uniform(k4, (3 * H,), jnp.float32, -bound, bound),
        ))
    key, k1, k2 = jax.random.split(key, 3)
    w_lin = jax.random.uniform(k1, (H, gen_features_out), jnp.float32, -bound, bound)
    b_lin = jax.random.uniform(k2, (gen_features_out,), jnp.float32, -bound, bound)
    return dict(layers=layers, w_lin=w_lin, b_lin=b_lin)


def _bf16_mm(a, w):
    return jnp.dot(a.astype(jnp.bfloat16), w.astype(jnp.bfloat16),
                   preferred_element_type=jnp.float32)


def reference_forward(x, params):
    """Pure-JAX GRU+Linear reference mirroring the kernel numerics
    (bf16 matmul operands, f32 accumulation and gate math)."""
    B, S, _ = x.shape
    layers = params["layers"]
    H = layers[0]["w_hh"].shape[0]
    hs = [jnp.zeros((B, H), jnp.float32) for _ in layers]
    outs = []
    for t in range(S):
        inp = x[:, t, :]
        for l, lp in enumerate(layers):
            gi = _bf16_mm(inp, lp["w_ih"]) + lp["b_ih"][None, :]
            gh = _bf16_mm(hs[l], lp["w_hh"]) + lp["b_hh"][None, :]
            r = jax.nn.sigmoid(gi[:, :H] + gh[:, :H])
            z = jax.nn.sigmoid(gi[:, H:2 * H] + gh[:, H:2 * H])
            n = jnp.tanh(gi[:, 2 * H:] + r * gh[:, 2 * H:])
            hs[l] = (1.0 - z) * n + z * hs[l]
            inp = hs[l]
        outs.append(_bf16_mm(inp, params["w_lin"]) + params["b_lin"][None, :])
    return jnp.stack(outs, axis=1)


if __name__ == "__main__":
    # Small shapes consistent with the module's forward.
    noise_vector_size = 16
    rnn_layers = 2
    rnn_hidden_size = 32
    gen_features_out = 24
    batch, seq = 2, 8

    key = jax.random.PRNGKey(0)
    key, xkey = jax.random.split(key)
    x = jax.random.normal(xkey, (batch, seq, noise_vector_size), jnp.float32)

    params = init_params(key, noise_vector_size, rnn_layers,
                         rnn_hidden_size, gen_features_out)

    y = rnn_hist_gen_forward(x, params, t_chunk=8, batch_block=2)
    y = jax.block_until_ready(y)

    y_ref = reference_forward(x, params)
    assert y.shape == (batch, seq, gen_features_out), y.shape
    max_err = float(jnp.max(jnp.abs(y - y_ref)))
    assert jnp.allclose(y, y_ref, atol=1e-3, rtol=1e-3), max_err

    print("KERNEL_OK")
</pallas_src>

<mosaic_0001>
module attributes {stable_mosaic.version = 11 : i64} {
  func.func @kernel(%arg0: i32, %arg1: i32, %arg2: memref<2x8x16xf32, #tpu.memory_space<vmem>>, %arg3: memref<16x96xbf16, #tpu.memory_space<vmem>>, %arg4: memref<32x96xbf16, #tpu.memory_space<vmem>>, %arg5: memref<1x96xf32, #tpu.memory_space<vmem>>, %arg6: memref<1x32xf32, #tpu.memory_space<vmem>>, %arg7: memref<32x96xbf16, #tpu.memory_space<vmem>>, %arg8: memref<32x96xbf16, #tpu.memory_space<vmem>>, %arg9: memref<1x96xf32, #tpu.memory_space<vmem>>, %arg10: memref<1x32xf32, #tpu.memory_space<vmem>>, %arg11: memref<32x24xbf16, #tpu.memory_space<vmem>>, %arg12: memref<1x24xf32, #tpu.memory_space<vmem>>, %arg13: memref<2x8x24xf32, #tpu.memory_space<vmem>>, %arg14: memref<2x2x32xf32, #tpu.memory_space<vmem>>, %arg15: memref<8x2x96xf32, #tpu.memory_space<vmem>>, %arg16: memref<8x2x32xbf16, #tpu.memory_space<vmem>>) attributes {dimension_semantics = [#tpu.dimension_semantics<parallel>, #tpu.dimension_semantics<arbitrary>], iteration_bounds = array<i64: 1, 1>, scalar_prefetch = 0 : i64, scratch_operands = 3 : i64, tpu.core_type = #tpu.core_type<tc>, window_params = [{transform_indices = @transform_0, window_bounds = array<i64: 2, 8, 16>}, {pipeline_mode = #tpu.pipeline_mode<synchronous>, transform_indices = @transform_1, window_bounds = array<i64: 16, 96>}, {pipeline_mode = #tpu.pipeline_mode<synchronous>, transform_indices = @transform_2, window_bounds = array<i64: 32, 96>}, {pipeline_mode = #tpu.pipeline_mode<synchronous>, transform_indices = @transform_3, window_bounds = array<i64: 1, 96>}, {pipeline_mode = #tpu.pipeline_mode<synchronous>, transform_indices = @transform_4, window_bounds = array<i64: 1, 32>}, {pipeline_mode = #tpu.pipeline_mode<synchronous>, transform_indices = @transform_5, window_bounds = array<i64: 32, 96>}, {pipeline_mode = #tpu.pipeline_mode<synchronous>, transform_indices = @transform_6, window_bounds = array<i64: 32, 96>}, {pipeline_mode = #tpu.pipeline_mode<synchronous>, transform_indices = @transform_7, window_bounds = array<i64: 1, 96>}, {pipeline_mode = #tpu.pipeline_mode<synchronous>, transform_indices = @transform_8, window_bounds = array<i64: 1, 32>}, {pipeline_mode = #tpu.pipeline_mode<synchronous>, transform_indices = @transform_9, window_bounds = array<i64: 32, 24>}, {pipeline_mode = #tpu.pipeline_mode<synchronous>, transform_indices = @transform_10, window_bounds = array<i64: 1, 24>}, {transform_indices = @transform_11, window_bounds = array<i64: 2, 8, 24>}]} {
    %c0_i32 = arith.constant 0 : i32
    %0 = arith.cmpi eq, %arg1, %c0_i32 : i32
    %1 = arith.extui %0 : i1 to i32
    %c0_i32_0 = arith.constant 0 : i32
    %2 = arith.cmpi ne, %1, %c0_i32_0 : i32
    scf.if %2 {
      %cst_195 = arith.constant 0.000000e+00 : f32
      %659 = vector.broadcast %cst_195 : f32 to vector<2x2x32xf32>
      %c0_196 = arith.constant 0 : index
      %c0_197 = arith.constant 0 : index
      %c0_198 = arith.constant 0 : index
      %660 = vector.load %arg14[%c0_196, %c0_197, %c0_198] : memref<2x2x32xf32, #tpu.memory_space<vmem>>, vector<2x2x32xf32>
      tpu.vector_store %arg14[%c0_196, %c0_197, %c0_198], %659 {strides = array<i32>} : memref<2x2x32xf32, #tpu.memory_space<vmem>>, vector<2x2x32xf32>,
    } else {
    }
    %c0 = arith.constant 0 : index
    %c0_1 = arith.constant 0 : index
    %3 = vector.load %arg3[%c0, %c0_1] : memref<16x96xbf16, #tpu.memory_space<vmem>>, vector<16x96xbf16>
    %c0_2 = arith.constant 0 : index
    %c0_3 = arith.constant 0 : index
    %4 = vector.load %arg4[%c0_2, %c0_3] : memref<32x96xbf16, #tpu.memory_space<vmem>>, vector<32x96xbf16>
    %c0_4 = arith.constant 0 : index
    %c0_5 = arith.constant 0 : index
    %5 = vector.load %arg5[%c0_4, %c0_5] : memref<1x96xf32, #tpu.memory_space<vmem>>, vector<1x96xf32>
    %c0_6 = arith.constant 0 : index
    %c0_7 = arith.constant 0 : index
    %6 = vector.load %arg6[%c0_6, %c0_7] : memref<1x32xf32, #tpu.memory_space<vmem>>, vector<1x32xf32>
    %7 = vector.shape_cast %6 : vector<1x32xf32> to vector<1x32xf32>
    %8 = vector.broadcast %7 : vector<1x32xf32> to vector<2x32xf32>
    %c0_8 = arith.constant 0 : index
    %c0_9 = arith.constant 0 : index
    %c0_10 = arith.constant 0 : index
    %9 = vector.load %arg2[%c0_8, %c0_9, %c0_10] : memref<2x8x16xf32, #tpu.memory_space<vmem>>, vector<2x8x16xf32>
    %10 = arith.truncf %9 : vector<2x8x16xf32> to vector<2x8x16xbf16>
    %11 = vector.shape_cast %10 : vector<2x8x16xbf16> to vector<16x16xbf16>
    %cst = arith.constant dense<0.000000e+00> : vector<16x96xf32>
    %12 = tpu.matmul %11, %3, %cst {dimension_numbers = #tpu.dot_dimension_numbers<[1], [0], [0], [1], [0, 0, 1, 1], [], []>} : vector<16x16xbf16>, vector<16x96xbf16>, vector<16x96xf32> -> vector<16x96xf32>
    %13 = vector.broadcast %5 : vector<1x96xf32> to vector<16x96xf32>
    %14 = arith.addf %12, %13 : vector<16x96xf32>
    %15 = vector.shape_cast %14 : vector<16x96xf32> to vector<2x8x96xf32>
    %16 = vector.extract_strided_slice %15 {offsets = [0, 0, 0], sizes = [1, 8, 96], strides = [1, 1, 1]} : vector<2x8x96xf32> to vector<1x8x96xf32>
    %17 = vector.shape_cast %16 : vector<1x8x96xf32> to vector<8x96xf32>
    %c0_11 = arith.constant 0 : index
    %c0_12 = arith.constant 0 : index
    %c0_13 = arith.constant 0 : index
    %18 = vector.load %arg15[%c0_11, %c0_12, %c0_13] : memref<8x2x96xf32, #tpu.memory_space<vmem>>, vector<8x1x96xf32>
    %19 = vector.shape_cast %18 : vector<8x1x96xf32> to vector<8x96xf32>
    %20 = vector.shape_cast %17 : vector<8x96xf32> to vector<8x1x96xf32>
    tpu.vector_store %arg15[%c0_11, %c0_12, %c0_13], %20 {strides = array<i32>} : memref<8x2x96xf32, #tpu.memory_space<vmem>>, vector<8x1x96xf32>,
    %21 = vector.extract_strided_slice %15 {offsets = [1, 0, 0], sizes = [1, 8, 96], strides = [1, 1, 1]} : vector<2x8x96xf32> to vector<1x8x96xf32>
    %22 = vector.shape_cast %21 : vector<1x8x96xf32> to vector<8x96xf32>
    %c0_14 = arith.constant 0 : index
    %c1 = arith.constant 1 : index
    %c0_15 = arith.constant 0 : index
    %23 = vector.load %arg15[%c0_14, %c1, %c0_15] : memref<8x2x96xf32, #tpu.memory_space<vmem>>, vector<8x1x96xf32>
    %24 = vector.shape_cast %23 : vector<8x1x96xf32> to vector<8x96xf32>
    %25 = vector.shape_cast %22 : vector<8x96xf32> to vector<8x1x96xf32>
    tpu.vector_store %arg15[%c0_14, %c1, %c0_15], %25 {strides = array<i32>} : memref<8x2x96xf32, #tpu.memory_space<vmem>>, vector<8x1x96xf32>,
    %c0_16 = arith.constant 0 : index
    %c0_17 = arith.constant 0 : index
    %c0_18 = arith.constant 0 : index
    %26 = vector.load %arg14[%c0_16, %c0_17, %c0_18] : memref<2x2x32xf32, #tpu.memory_space<vmem>>, vector<1x2x32xf32>
    %27 = vector.shape_cast %26 : vector<1x2x32xf32> to vector<2x32xf32>
    %c0_i32_19 = arith.constant 0 : i32
    %28 = arith.index_cast %c0_i32_19 : i32 to index
    %c0_20 = arith.constant 0 : index
    %c0_21 = arith.constant 0 : index
    %29 = vector.load %arg15[%28, %c0_20, %c0_21] : memref<8x2x96xf32, #tpu.memory_space<vmem>>, vector<1x2x96xf32>
    %30 = vector.shape_cast %29 : vector<1x2x96xf32> to vector<2x96xf32>
    %31 = arith.truncf %27 : vector<2x32xf32> to vector<2x32xbf16>
    %cst_22 = arith.constant dense<0.000000e+00> : vector<2x96xf32>
    %32 = tpu.matmul %31, %4, %cst_22 {dimension_numbers = #tpu.dot_dimension_numbers<[1], [0], [0], [1], [0, 0, 1, 1], [], []>} : vector<2x32xbf16>, vector<32x96xbf16>, vector<2x96xf32> -> vector<2x96xf32>
    %33 = vector.extract_strided_slice %30 {offsets = [0, 0], sizes = [2, 32], strides = [1, 1]} : vector<2x96xf32> to vector<2x32xf32>
    %34 = vector.extract_strided_slice %32 {offsets = [0, 0], sizes = [2, 32], strides = [1, 1]} : vector<2x96xf32> to vector<2x32xf32>
    %35 = arith.addf %33, %34 : vector<2x32xf32>
    %36 = arith.negf %35 : vector<2x32xf32>
    %37 = math.exp %36 : vector<2x32xf32>
    %cst_23 = arith.constant 1.000000e+00 : f32
    %38 = vector.broadcast %cst_23 : f32 to vector<2x32xf32>
    %39 = arith.addf %38, %37 : vector<2x32xf32>
    %40 = arith.divf %38, %39 : vector<2x32xf32>
    %41 = vector.extract_strided_slice %30 {offsets = [0, 32], sizes = [2, 32], strides = [1, 1]} : vector<2x96xf32> to vector<2x32xf32>
    %42 = vector.extract_strided_slice %32 {offsets = [0, 32], sizes = [2, 32], strides = [1, 1]} : vector<2x96xf32> to vector<2x32xf32>
    %43 = arith.addf %41, %42 : vector<2x32xf32>
    %44 = arith.negf %43 : vector<2x32xf32>
    %45 = math.exp %44 : vector<2x32xf32>
    %cst_24 = arith.constant 1.000000e+00 : f32
    %46 = vector.broadcast %cst_24 : f32 to vector<2x32xf32>
    %47 = arith.addf %46, %45 : vector<2x32xf32>
    %48 = arith.divf %46, %47 : vector<2x32xf32>
    %49 = vector.extract_strided_slice %30 {offsets = [0, 64], sizes = [2, 32], strides = [1, 1]} : vector<2x96xf32> to vector<2x32xf32>
    %50 = vector.extract_strided_slice %32 {offsets = [0, 64], sizes = [2, 32], strides = [1, 1]} : vector<2x96xf32> to vector<2x32xf32>
    %51 = arith.addf %50, %8 : vector<2x32xf32>
    %52 = arith.mulf %40, %51 : vector<2x32xf32>
    %53 = arith.addf %49, %52 : vector<2x32xf32>
    %54 = math.tanh %53 : vector<2x32xf32>
    %cst_25 = arith.constant 1.000000e+00 : f32
    %55 = vector.broadcast %cst_25 : f32 to vector<2x32xf32>
    %56 = arith.subf %55, %48 : vector<2x32xf32>
    %57 = arith.mulf %56, %54 : vector<2x32xf32>
    %58 = arith.mulf %48, %27 : vector<2x32xf32>
    %59 = arith.addf %57, %58 : vector<2x32xf32>
    %60 = arith.truncf %59 : vector<2x32xf32> to vector<2x32xbf16>
    %61 = arith.index_cast %c0_i32_19 : i32 to index
    %c0_26 = arith.constant 0 : index
    %c0_27 = arith.constant 0 : index
    %62 = vector.load %arg16[%61, %c0_26, %c0_27] : memref<8x2x32xbf16, #tpu.memory_space<vmem>>, vector<1x2x32xbf16>
    %63 = vector.shape_cast %62 : vector<1x2x32xbf16> to vector<2x32xbf16>
    %64 = vector.shape_cast %60 : vector<2x32xbf16> to vector<1x2x32xbf16>
    tpu.vector_store %arg16[%61, %c0_26, %c0_27], %64 {strides = array<i32>} : memref<8x2x32xbf16, #tpu.memory_space<vmem>>, vector<1x2x32xbf16>,
    %c1_i32 = arith.constant 1 : i32
    %65 = arith.index_cast %c1_i32 : i32 to index
    %c0_28 = arith.constant 0 : index
    %c0_29 = arith.constant 0 : index
    %66 = vector.load %arg15[%65, %c0_28, %c0_29] : memref<8x2x96xf32, #tpu.memory_space<vmem>>, vector<1x2x96xf32>
    %67 = vector.shape_cast %66 : vector<1x2x96xf32> to vector<2x96xf32>
    %68 = arith.truncf %59 : vector<2x32xf32> to vector<2x32xbf16>
    %cst_30 = arith.constant dense<0.000000e+00> : vector<2x96xf32>
    %69 = tpu.matmul %68, %4, %cst_30 {dimension_numbers = #tpu.dot_dimension_numbers<[1], [0], [0], [1], [0, 0, 1, 1], [], []>} : vector<2x32xbf16>, vector<32x96xbf16>, vector<2x96xf32> -> vector<2x96xf32>
    %70 = vector.extract_strided_slice %67 {offsets = [0, 0], sizes = [2, 32], strides = [1, 1]} : vector<2x96xf32> to vector<2x32xf32>
    %71 = vector.extract_strided_slice %69 {offsets = [0, 0], sizes = [2, 32], strides = [1, 1]} : vector<2x96xf32> to vector<2x32xf32>
    %72 = arith.addf %70, %71 : vector<2x32xf32>
    %73 = arith.negf %72 : vector<2x32xf32>
    %74 = math.exp %73 : vector<2x32xf32>
    %cst_31 = arith.constant 1.000000e+00 : f32
    %75 = vector.broadcast %cst_31 : f32 to vector<2x32xf32>
    %76 = arith.addf %75, %74 : vector<2x32xf32>
    %77 = arith.divf %75, %76 : vector<2x32xf32>
    %78 = vector.extract_strided_slice %67 {offsets = [0, 32], sizes = [2, 32], strides = [1, 1]} : vector<2x96xf32> to vector<2x32xf32>
    %79 = vector.extract_strided_slice %69 {offsets = [0, 32], sizes = [2, 32], strides = [1, 1]} : vector<2x96xf32> to vector<2x32xf32>
    %80 = arith.addf %78, %79 : vector<2x32xf32>
    %81 = arith.negf %80 : vector<2x32xf32>
    %82 = math.exp %81 : vector<2x32xf32>
    %cst_32 = arith.constant 1.000000e+00 : f32
    %83 = vector.broadcast %cst_32 : f32 to vector<2x32xf32>
    %84 = arith.addf %83, %82 : vector<2x32xf32>
    %85 = arith.divf %83, %84 : vector<2x32xf32>
    %86 = vector.extract_strided_slice %67 {offsets = [0, 64], sizes = [2, 32], strides = [1, 1]} : vector<2x96xf32> to vector<2x32xf32>
    %87 = vector.extract_strided_slice %69 {offsets = [0, 64], sizes = [2, 32], strides = [1, 1]} : vector<2x96xf32> to vector<2x32xf32>
    %88 = arith.addf %87, %8 : vector<2x32xf32>
    %89 = arith.mulf %77, %88 : vector<2x32xf32>
    %90 = arith.addf %86, %89 : vector<2x32xf32>
    %91 = math.tanh %90 : vector<2x32xf32>
    %cst_33 = arith.constant 1.000000e+00 : f32
    %92 = vector.broadcast %cst_33 : f32 to vector<2x32xf32>
    %93 = arith.subf %92, %85 : vector<2x32xf32>
    %94 = arith.mulf %93, %91 : vector<2x32xf32>
    %95 = arith.mulf %85, %59 : vector<2x32xf32>
    %96 = arith.addf %94, %95 : vector<2x32xf32>
    %97 = arith.truncf %96 : vector<2x32xf32> to vector<2x32xbf16>
    %98 = arith.index_cast %c1_i32 : i32 to index
    %c0_34 = arith.constant 0 : index
    %c0_35 = arith.constant 0 : index
    %99 = vector.load %arg16[%98, %c0_34, %c0_35] : memref<8x2x32xbf16, #tpu.memory_space<vmem>>, vector<1x2x32xbf16>
    %100 = vector.shape_cast %99 : vector<1x2x32xbf16> to vector<2x32xbf16>
    %101 = vector.shape_cast %97 : vector<2x32xbf16> to vector<1x2x32xbf16>
    tpu.vector_store %arg16[%98, %c0_34, %c0_35], %101 {strides = array<i32>} : memref<8x2x32xbf16, #tpu.memory_space<vmem>>, vector<1x2x32xbf16>,
    %c2_i32 = arith.constant 2 : i32
    %102 = arith.index_cast %c2_i32 : i32 to index
    %c0_36 = arith.constant 0 : index
    %c0_37 = arith.constant 0 : index
    %103 = vector.load %arg15[%102, %c0_36, %c0_37] : memref<8x2x96xf32, #tpu.memory_space<vmem>>, vector<1x2x96xf32>
    %104 = vector.shape_cast %103 : vector<1x2x96xf32> to vector<2x96xf32>
    %105 = arith.truncf %96 : vector<2x32xf32> to vector<2x32xbf16>
    %cst_38 = arith.constant dense<0.000000e+00> : vector<2x96xf32>
    %106 = tpu.matmul %105, %4, %cst_38 {dimension_numbers = #tpu.dot_dimension_numbers<[1], [0], [0], [1], [0, 0, 1, 1], [], []>} : vector<2x32xbf16>, vector<32x96xbf16>, vector<2x96xf32> -> vector<2x96xf32>
    %107 = vector.extract_strided_slice %104 {offsets = [0, 0], sizes = [2, 32], strides = [1, 1]} : vector<2x96xf32> to vector<2x32xf32>
    %108 = vector.extract_strided_slice %106 {offsets = [0, 0], sizes = [2, 32], strides = [1, 1]} : vector<2x96xf32> to vector<2x32xf32>
    %109 = arith.addf %107, %108 : vector<2x32xf32>
    %110 = arith.negf %109 : vector<2x32xf32>
    %111 = math.exp %110 : vector<2x32xf32>
    %cst_39 = arith.constant 1.000000e+00 : f32
    %112 = vector.broadcast %cst_39 : f32 to vector<2x32xf32>
    %113 = arith.addf %112, %111 : vector<2x32xf32>
    %114 = arith.divf %112, %113 : vector<2x32xf32>
    %115 = vector.extract_strided_slice %104 {offsets = [0, 32], sizes = [2, 32], strides = [1, 1]} : vector<2x96xf32> to vector<2x32xf32>
    %116 = vector.extract_strided_slice %106 {offsets = [0, 32], sizes = [2, 32], strides = [1, 1]} : vector<2x96xf32> to vector<2x32xf32>
    %117 = arith.addf %115, %116 : vector<2x32xf32>
    %118 = arith.negf %117 : vector<2x32xf32>
    %119 = math.exp %118 : vector<2x32xf32>
    %cst_40 = arith.constant 1.000000e+00 : f32
    %120 = vector.broadcast %cst_40 : f32 to vector<2x32xf32>
    %121 = arith.addf %120, %119 : vector<2x32xf32>
    %122 = arith.divf %120, %121 : vector<2x32xf32>
    %123 = vector.extract_strided_slice %104 {offsets = [0, 64], sizes = [2, 32], strides = [1, 1]} : vector<2x96xf32> to vector<2x32xf32>
    %124 = vector.extract_strided_slice %106 {offsets = [0, 64], sizes = [2, 32], strides = [1, 1]} : vector<2x96xf32> to vector<2x32xf32>
    %125 = arith.addf %124, %8 : vector<2x32xf32>
    %126 = arith.mulf %114, %125 : vector<2x32xf32>
    %127 = arith.addf %123, %126 : vector<2x32xf32>
    %128 = math.tanh %127 : vector<2x32xf32>
    %cst_41 = arith.constant 1.000000e+00 : f32
    %129 = vector.broadcast %cst_41 : f32 to vector<2x32xf32>
    %130 = arith.subf %129, %122 : vector<2x32xf32>
    %131 = arith.mulf %130, %128 : vector<2x32xf32>
    %132 = arith.mulf %122, %96 : vector<2x32xf32>
    %133 = arith.addf %131, %132 : vector<2x32xf32>
    %134 = arith.truncf %133 : vector<2x32xf32> to vector<2x32xbf16>
    %135 = arith.index_cast %c2_i32 : i32 to index
    %c0_42 = arith.constant 0 : index
    %c0_43 = arith.constant 0 : index
    %136 = vector.load %arg16[%135, %c0_42, %c0_43] : memref<8x2x32xbf16, #tpu.memory_space<vmem>>, vector<1x2x32xbf16>
    %137 = vector.shape_cast %136 : vector<1x2x32xbf16> to vector<2x32xbf16>
    %138 = vector.shape_cast %134 : vector<2x32xbf16> to vector<1x2x32xbf16>
    tpu.vector_store %arg16[%135, %c0_42, %c0_43], %138 {strides = array<i32>} : memref<8x2x32xbf16, #tpu.memory_space<vmem>>, vector<1x2x32xbf16>,
    %c3_i32 = arith.constant 3 : i32
    %139 = arith.index_cast %c3_i32 : i32 to index
    %c0_44 = arith.constant 0 : index
    %c0_45 = arith.constant 0 : index
    %140 = vector.load %arg15[%139, %c0_44, %c0_45] : memref<8x2x96xf32, #tpu.memory_space<vmem>>, vector<1x2x96xf32>
    %141 = vector.shape_cast %140 : vector<1x2x96xf32> to vector<2x96xf32>
    %142 = arith.truncf %133 : vector<2x32xf32> to vector<2x32xbf16>
    %cst_46 = arith.constant dense<0.000000e+00> : vector<2x96xf32>
    %143 = tpu.matmul %142, %4, %cst_46 {dimension_numbers = #tpu.dot_dimension_numbers<[1], [0], [0], [1], [0, 0, 1, 1], [], []>} : vector<2x32xbf16>, vector<32x96xbf16>, vector<2x96xf32> -> vector<2x96xf32>
    %144 = vector.extract_strided_slice %141 {offsets = [0, 0], sizes = [2, 32], strides = [1, 1]} : vector<2x96xf32> to vector<2x32xf32>
    %145 = vector.extract_strided_slice %143 {offsets = [0, 0], sizes = [2, 32], strides = [1, 1]} : vector<2x96xf32> to vector<2x32xf32>
    %146 = arith.addf %144, %145 : vector<2x32xf32>
    %147 = arith.negf %146 : vector<2x32xf32>
    %148 = math.exp %147 : vector<2x32xf32>
    %cst_47 = arith.constant 1.000000e+00 : f32
    %149 = vector.broadcast %cst_47 : f32 to vector<2x32xf32>
    %150 = arith.addf %149, %148 : vector<2x32xf32>
    %151 = arith.divf %149, %150 : vector<2x32xf32>
    %152 = vector.extract_strided_slice %141 {offsets = [0, 32], sizes = [2, 32], strides = [1, 1]} : vector<2x96xf32> to vector<2x32xf32>
    %153 = vector.extract_strided_slice %143 {offsets = [0, 32], sizes = [2, 32], strides = [1, 1]} : vector<2x96xf32> to vector<2x32xf32>
    %154 = arith.addf %152, %153 : vector<2x32xf32>
    %155 = arith.negf %154 : vector<2x32xf32>
    %156 = math.exp %155 : vector<2x32xf32>
    %cst_48 = arith.constant 1.000000e+00 : f32
    %157 = vector.broadcast %cst_48 : f32 to vector<2x32xf32>
    %158 = arith.addf %157, %156 : vector<2x32xf32>
    %159 = arith.divf %157, %158 : vector<2x32xf32>
    %160 = vector.extract_strided_slice %141 {offsets = [0, 64], sizes = [2, 32], strides = [1, 1]} : vector<2x96xf32> to vector<2x32xf32>
    %161 = vector.extract_strided_slice %143 {offsets = [0, 64], sizes = [2, 32], strides = [1, 1]} : vector<2x96xf32> to vector<2x32xf32>
    %162 = arith.addf %161, %8 : vector<2x32xf32>
    %163 = arith.mulf %151, %162 : vector<2x32xf32>
    %164 = arith.addf %160, %163 : vector<2x32xf32>
    %165 = math.tanh %164 : vector<2x32xf32>
    %cst_49 = arith.constant 1.000000e+00 : f32
    %166 = vector.broadcast %cst_49 : f32 to vector<2x32xf32>
    %167 = arith.subf %166, %159 : vector<2x32xf32>
    %168 = arith.mulf %167, %165 : vector<2x32xf32>
    %169 = arith.mulf %159, %133 : vector<2x32xf32>
    %170 = arith.addf %168, %169 : vector<2x32xf32>
    %171 = arith.truncf %170 : vector<2x32xf32> to vector<2x32xbf16>
    %172 = arith.index_cast %c3_i32 : i32 to index
    %c0_50 = arith.constant 0 : index
    %c0_51 = arith.constant 0 : index
    %173 = vector.load %arg16[%172, %c0_50, %c0_51] : memref<8x2x32xbf16, #tpu.memory_space<vmem>>, vector<1x2x32xbf16>
    %174 = vector.shape_cast %173 : vector<1x2x32xbf16> to vector<2x32xbf16>
    %175 = vector.shape_cast %171 : vector<2x32xbf16> to vector<1x2x32xbf16>
    tpu.vector_store %arg16[%172, %c0_50, %c0_51], %175 {strides = array<i32>} : memref<8x2x32xbf16, #tpu.memory_space<vmem>>, vector<1x2x32xbf16>,
    %c4_i32 = arith.constant 4 : i32
    %176 = arith.index_cast %c4_i32 : i32 to index
    %c0_52 = arith.constant 0 : index
    %c0_53 = arith.constant 0 : index
    %177 = vector.load %arg15[%176, %c0_52, %c0_53] : memref<8x2x96xf32, #tpu.memory_space<vmem>>, vector<1x2x96xf32>
    %178 = vector.shape_cast %177 : vector<1x2x96xf32> to vector<2x96xf32>
    %179 = arith.truncf %170 : vector<2x32xf32> to vector<2x32xbf16>
    %cst_54 = arith.constant dense<0.000000e+00> : vector<2x96xf32>
    %180 = tpu.matmul %179, %4, %cst_54 {dimension_numbers = #tpu.dot_dimension_numbers<[1], [0], [0], [1], [0, 0, 1, 1], [], []>} : vector<2x32xbf16>, vector<32x96xbf16>, vector<2x96xf32> -> vector<2x96xf32>
    %181 = vector.extract_strided_slice %178 {offsets = [0, 0], sizes = [2, 32], strides = [1, 1]} : vector<2x96xf32> to vector<2x32xf32>
    %182 = vector.extract_strided_slice %180 {offsets = [0, 0], sizes = [2, 32], strides = [1, 1]} : vector<2x96xf32> to vector<2x32xf32>
    %183 = arith.addf %181, %182 : vector<2x32xf32>
    %184 = arith.negf %183 : vector<2x32xf32>
    %185 = math.exp %184 : vector<2x32xf32>
    %cst_55 = arith.constant 1.000000e+00 : f32
    %186 = vector.broadcast %cst_55 : f32 to vector<2x32xf32>
    %187 = arith.addf %186, %185 : vector<2x32xf32>
    %188 = arith.divf %186, %187 : vector<2x32xf32>
    %189 = vector.extract_strided_slice %178 {offsets = [0, 32], sizes = [2, 32], strides = [1, 1]} : vector<2x96xf32> to vector<2x32xf32>
    %190 = vector.extract_strided_slice %180 {offsets = [0, 32], sizes = [2, 32], strides = [1, 1]} : vector<2x96xf32> to vector<2x32xf32>
    %191 = arith.addf %189, %190 : vector<2x32xf32>
    %192 = arith.negf %191 : vector<2x32xf32>
    %193 = math.exp %192 : vector<2x32xf32>
    %cst_56 = arith.constant 1.000000e+00 : f32
    %194 = vector.broadcast %cst_56 : f32 to vector<2x32xf32>
    %195 = arith.addf %194, %193 : vector<2x32xf32>
    %196 = arith.divf %194, %195 : vector<2x32xf32>
    %197 = vector.extract_strided_slice %178 {offsets = [0, 64], sizes = [2, 32], strides = [1, 1]} : vector<2x96xf32> to vector<2x32xf32>
    %198 = vector.extract_strided_slice %180 {offsets = [0, 64], sizes = [2, 32], strides = [1, 1]} : vector<2x96xf32> to vector<2x32xf32>
    %199 = arith.addf %198, %8 : vector<2x32xf32>
    %200 = arith.mulf %188, %199 : vector<2x32xf32>
    %201 = arith.addf %197, %200 : vector<2x32xf32>
    %202 = math.tanh %201 : vector<2x32xf32>
    %cst_57 = arith.constant 1.000000e+00 : f32
    %203 = vector.broadcast %cst_57 : f32 to vector<2x32xf32>
    %204 = arith.subf %203, %196 : vector<2x32xf32>
    %205 = arith.mulf %204, %202 : vector<2x32xf32>
    %206 = arith.mulf %196, %170 : vector<2x32xf32>
    %207 = arith.addf %205, %206 : vector<2x32xf32>
    %208 = arith.truncf %207 : vector<2x32xf32> to vector<2x32xbf16>
    %209 = arith.index_cast %c4_i32 : i32 to index
    %c0_58 = arith.constant 0 : index
    %c0_59 = arith.constant 0 : index
    %210 = vector.load %arg16[%209, %c0_58, %c0_59] : memref<8x2x32xbf16, #tpu.memory_space<vmem>>, vector<1x2x32xbf16>
    %211 = vector.shape_cast %210 : vector<1x2x32xbf16> to vector<2x32xbf16>
    %212 = vector.shape_cast %208 : vector<2x32xbf16> to vector<1x2x32xbf16>
    tpu.vector_store %arg16[%209, %c0_58, %c0_59], %212 {strides = array<i32>} : memref<8x2x32xbf16, #tpu.memory_space<vmem>>, vector<1x2x32xbf16>,
    %c5_i32 = arith.constant 5 : i32
    %213 = arith.index_cast %c5_i32 : i32 to index
    %c0_60 = arith.constant 0 : index
    %c0_61 = arith.constant 0 : index
    %214 = vector.load %arg15[%213, %c0_60, %c0_61] : memref<8x2x96xf32, #tpu.memory_space<vmem>>, vector<1x2x96xf32>
    %215 = vector.shape_cast %214 : vector<1x2x96xf32> to vector<2x96xf32>
    %216 = arith.truncf %207 : vector<2x32xf32> to vector<2x32xbf16>
    %cst_62 = arith.constant dense<0.000000e+00> : vector<2x96xf32>
    %217 = tpu.matmul %216, %4, %cst_62 {dimension_numbers = #tpu.dot_dimension_numbers<[1], [0], [0], [1], [0, 0, 1, 1], [], []>} : vector<2x32xbf16>, vector<32x96xbf16>, vector<2x96xf32> -> vector<2x96xf32>
    %218 = vector.extract_strided_slice %215 {offsets = [0, 0], sizes = [2, 32], strides = [1, 1]} : vector<2x96xf32> to vector<2x32xf32>
    %219 = vector.extract_strided_slice %217 {offsets = [0, 0], sizes = [2, 32], strides = [1, 1]} : vector<2x96xf32> to vector<2x32xf32>
    %220 = arith.addf %218, %219 : vector<2x32xf32>
    %221 = arith.negf %220 : vector<2x32xf32>
    %222 = math.exp %221 : vector<2x32xf32>
    %cst_63 = arith.constant 1.000000e+00 : f32
    %223 = vector.broadcast %cst_63 : f32 to vector<2x32xf32>
    %224 = arith.addf %223, %222 : vector<2x32xf32>
    %225 = arith.divf %223, %224 : vector<2x32xf32>
    %226 = vector.extract_strided_slice %215 {offsets = [0, 32], sizes = [2, 32], strides = [1, 1]} : vector<2x96xf32> to vector<2x32xf32>
    %227 = vector.extract_strided_slice %217 {offsets = [0, 32], sizes = [2, 32], strides = [1, 1]} : vector<2x96xf32> to vector<2x32xf32>
    %228 = arith.addf %226, %227 : vector<2x32xf32>
    %229 = arith.negf %228 : vector<2x32xf32>
    %230 = math.exp %229 : vector<2x32xf32>
    %cst_64 = arith.constant 1.000000e+00 : f32
    %231 = vector.broadcast %cst_64 : f32 to vector<2x32xf32>
    %232 = arith.addf %231, %230 : vector<2x32xf32>
    %233 = arith.divf %231, %232 : vector<2x32xf32>
    %234 = vector.extract_strided_slice %215 {offsets = [0, 64], sizes = [2, 32], strides = [1, 1]} : vector<2x96xf32> to vector<2x32xf32>
    %235 = vector.extract_strided_slice %217 {offsets = [0, 64], sizes = [2, 32], strides = [1, 1]} : vector<2x96xf32> to vector<2x32xf32>
    %236 = arith.addf %235, %8 : vector<2x32xf32>
    %237 = arith.mulf %225, %236 : vector<2x32xf32>
    %238 = arith.addf %234, %237 : vector<2x32xf32>
    %239 = math.tanh %238 : vector<2x32xf32>
    %cst_65 = arith.constant 1.000000e+00 : f32
    %240 = vector.broadcast %cst_65 : f32 to vector<2x32xf32>
    %241 = arith.subf %240, %233 : vector<2x32xf32>
    %242 = arith.mulf %241, %239 : vector<2x32xf32>
    %243 = arith.mulf %233, %207 : vector<2x32xf32>
    %244 = arith.addf %242, %243 : vector<2x32xf32>
    %245 = arith.truncf %244 : vector<2x32xf32> to vector<2x32xbf16>
    %246 = arith.index_cast %c5_i32 : i32 to index
    %c0_66 = arith.constant 0 : index
    %c0_67 = arith.constant 0 : index
    %247 = vector.load %arg16[%246, %c0_66, %c0_67] : memref<8x2x32xbf16, #tpu.memory_space<vmem>>, vector<1x2x32xbf16>
    %248 = vector.shape_cast %247 : vector<1x2x32xbf16> to vector<2x32xbf16>
    %249 = vector.shape_cast %245 : vector<2x32xbf16> to vector<1x2x32xbf16>
    tpu.vector_store %arg16[%246, %c0_66, %c0_67], %249 {strides = array<i32>} : memref<8x2x32xbf16, #tpu.memory_space<vmem>>, vector<1x2x32xbf16>,
    %c6_i32 = arith.constant 6 : i32
    %250 = arith.index_cast %c6_i32 : i32 to index
    %c0_68 = arith.constant 0 : index
    %c0_69 = arith.constant 0 : index
    %251 = vector.load %arg15[%250, %c0_68, %c0_69] : memref<8x2x96xf32, #tpu.memory_space<vmem>>, vector<1x2x96xf32>
    %252 = vector.shape_cast %251 : vector<1x2x96xf32> to vector<2x96xf32>
    %253 = arith.truncf %244 : vector<2x32xf32> to vector<2x32xbf16>
    %cst_70 = arith.constant dense<0.000000e+00> : vector<2x96xf32>
    %254 = tpu.matmul %253, %4, %cst_70 {dimension_numbers = #tpu.dot_dimension_numbers<[1], [0], [0], [1], [0, 0, 1, 1], [], []>} : vector<2x32xbf16>, vector<32x96xbf16>, vector<2x96xf32> -> vector<2x96xf32>
    %255 = vector.extract_strided_slice %252 {offsets = [0, 0], sizes = [2, 32], strides = [1, 1]} : vector<2x96xf32> to vector<2x32xf32>
    %256 = vector.extract_strided_slice %254 {offsets = [0, 0], sizes = [2, 32], strides = [1, 1]} : vector<2x96xf32> to vector<2x32xf32>
    %257 = arith.addf %255, %256 : vector<2x32xf32>
    %258 = arith.negf %257 : vector<2x32xf32>
    %259 = math.exp %258 : vector<2x32xf32>
    %cst_71 = arith.constant 1.000000e+00 : f32
    %260 = vector.broadcast %cst_71 : f32 to vector<2x32xf32>
    %261 = arith.addf %260, %259 : vector<2x32xf32>
    %262 = arith.divf %260, %261 : vector<2x32xf32>
    %263 = vector.extract_strided_slice %252 {offsets = [0, 32], sizes = [2, 32], strides = [1, 1]} : vector<2x96xf32> to vector<2x32xf32>
    %264 = vector.extract_strided_slice %254 {offsets = [0, 32], sizes = [2, 32], strides = [1, 1]} : vector<2x96xf32> to vector<2x32xf32>
    %265 = arith.addf %263, %264 : vector<2x32xf32>
    %266 = arith.negf %265 : vector<2x32xf32>
    %267 = math.exp %266 : vector<2x32xf32>
    %cst_72 = arith.constant 1.000000e+00 : f32
    %268 = vector.broadcast %cst_72 : f32 to vector<2x32xf32>
    %269 = arith.addf %268, %267 : vector<2x32xf32>
    %270 = arith.divf %268, %269 : vector<2x32xf32>
    %271 = vector.extract_strided_slice %252 {offsets = [0, 64], sizes = [2, 32], strides = [1, 1]} : vector<2x96xf32> to vector<2x32xf32>
    %272 = vector.extract_strided_slice %254 {offsets = [0, 64], sizes = [2, 32], strides = [1, 1]} : vector<2x96xf32> to vector<2x32xf32>
    %273 = arith.addf %272, %8 : vector<2x32xf32>
    %274 = arith.mulf %262, %273 : vector<2x32xf32>
    %275 = arith.addf %271, %274 : vector<2x32xf32>
    %276 = math.tanh %275 : vector<2x32xf32>
    %cst_73 = arith.constant 1.000000e+00 : f32
    %277 = vector.broadcast %cst_73 : f32 to vector<2x32xf32>
    %278 = arith.subf %277, %270 : vector<2x32xf32>
    %279 = arith.mulf %278, %276 : vector<2x32xf32>
    %280 = arith.mulf %270, %244 : vector<2x32xf32>
    %281 = arith.addf %279, %280 : vector<2x32xf32>
    %282 = arith.truncf %281 : vector<2x32xf32> to vector<2x32xbf16>
    %283 = arith.index_cast %c6_i32 : i32 to index
    %c0_74 = arith.constant 0 : index
    %c0_75 = arith.constant 0 : index
    %284 = vector.load %arg16[%283, %c0_74, %c0_75] : memref<8x2x32xbf16, #tpu.memory_space<vmem>>, vector<1x2x32xbf16>
    %285 = vector.shape_cast %284 : vector<1x2x32xbf16> to vector<2x32xbf16>
    %286 = vector.shape_cast %282 : vector<2x32xbf16> to vector<1x2x32xbf16>
    tpu.vector_store %arg16[%283, %c0_74, %c0_75], %286 {strides = array<i32>} : memref<8x2x32xbf16, #tpu.memory_space<vmem>>, vector<1x2x32xbf16>,
    %c7_i32 = arith.constant 7 : i32
    %287 = arith.index_cast %c7_i32 : i32 to index
    %c0_76 = arith.constant 0 : index
    %c0_77 = arith.constant 0 : index
    %288 = vector.load %arg15[%287, %c0_76, %c0_77] : memref<8x2x96xf32, #tpu.memory_space<vmem>>, vector<1x2x96xf32>
    %289 = vector.shape_cast %288 : vector<1x2x96xf32> to vector<2x96xf32>
    %290 = arith.truncf %281 : vector<2x32xf32> to vector<2x32xbf16>
    %cst_78 = arith.constant dense<0.000000e+00> : vector<2x96xf32>
    %291 = tpu.matmul %290, %4, %cst_78 {dimension_numbers = #tpu.dot_dimension_numbers<[1], [0], [0], [1], [0, 0, 1, 1], [], []>} : vector<2x32xbf16>, vector<32x96xbf16>, vector<2x96xf32> -> vector<2x96xf32>
    %292 = vector.extract_strided_slice %289 {offsets = [0, 0], sizes = [2, 32], strides = [1, 1]} : vector<2x96xf32> to vector<2x32xf32>
    %293 = vector.extract_strided_slice %291 {offsets = [0, 0], sizes = [2, 32], strides = [1, 1]} : vector<2x96xf32> to vector<2x32xf32>
    %294 = arith.addf %292, %293 : vector<2x32xf32>
    %295 = arith.negf %294 : vector<2x32xf32>
    %296 = math.exp %295 : vector<2x32xf32>
    %cst_79 = arith.constant 1.000000e+00 : f32
    %297 = vector.broadcast %cst_79 : f32 to vector<2x32xf32>
    %298 = arith.addf %297, %296 : vector<2x32xf32>
    %299 = arith.divf %297, %298 : vector<2x32xf32>
    %300 = vector.extract_strided_slice %289 {offsets = [0, 32], sizes = [2, 32], strides = [1, 1]} : vector<2x96xf32> to vector<2x32xf32>
    %301 = vector.extract_strided_slice %291 {offsets = [0, 32], sizes = [2, 32], strides = [1, 1]} : vector<2x96xf32> to vector<2x32xf32>
    %302 = arith.addf %300, %301 : vector<2x32xf32>
    %303 = arith.negf %302 : vector<2x32xf32>
    %304 = math.exp %303 : vector<2x32xf32>
    %cst_80 = arith.constant 1.000000e+00 : f32
    %305 = vector.broadcast %cst_80 : f32 to vector<2x32xf32>
    %306 = arith.addf %305, %304 : vector<2x32xf32>
    %307 = arith.divf %305, %306 : vector<2x32xf32>
    %308 = vector.extract_strided_slice %289 {offsets = [0, 64], sizes = [2, 32], strides = [1, 1]} : vector<2x96xf32> to vector<2x32xf32>
    %309 = vector.extract_strided_slice %291 {offsets = [0, 64], sizes = [2, 32], strides = [1, 1]} : vector<2x96xf32> to vector<2x32xf32>
    %310 = arith.addf %309, %8 : vector<2x32xf32>
    %311 = arith.mulf %299, %310 : vector<2x32xf32>
    %312 = arith.addf %308, %311 : vector<2x32xf32>
    %313 = math.tanh %312 : vector<2x32xf32>
    %cst_81 = arith.constant 1.000000e+00 : f32
    %314 = vector.broadcast %cst_81 : f32 to vector<2x32xf32>
    %315 = arith.subf %314, %307 : vector<2x32xf32>
    %316 = arith.mulf %315, %313 : vector<2x32xf32>
    %317 = arith.mulf %307, %281 : vector<2x32xf32>
    %318 = arith.addf %316, %317 : vector<2x32xf32>
    %319 = arith.truncf %318 : vector<2x32xf32> to vector<2x32xbf16>
    %320 = arith.index_cast %c7_i32 : i32 to index
    %c0_82 = arith.constant 0 : index
    %c0_83 = arith.constant 0 : index
    %321 = vector.load %arg16[%320, %c0_82, %c0_83] : memref<8x2x32xbf16, #tpu.memory_space<vmem>>, vector<1x2x32xbf16>
    %322 = vector.shape_cast %321 : vector<1x2x32xbf16> to vector<2x32xbf16>
    %323 = vector.shape_cast %319 : vector<2x32xbf16> to vector<1x2x32xbf16>
    tpu.vector_store %arg16[%320, %c0_82, %c0_83], %323 {strides = array<i32>} : memref<8x2x32xbf16, #tpu.memory_space<vmem>>, vector<1x2x32xbf16>,
    %c8_i32 = arith.constant 8 : i32
    %c0_84 = arith.constant 0 : index
    %c0_85 = arith.constant 0 : index
    %c0_86 = arith.constant 0 : index
    %324 = vector.load %arg14[%c0_84, %c0_85, %c0_86] : memref<2x2x32xf32, #tpu.memory_space<vmem>>, vector<1x2x32xf32>
    %325 = vector.shape_cast %324 : vector<1x2x32xf32> to vector<2x32xf32>
    %326 = vector.shape_cast %318 : vector<2x32xf32> to vector<1x2x32xf32>
    tpu.vector_store %arg14[%c0_84, %c0_85, %c0_86], %326 {strides = array<i32>} : memref<2x2x32xf32, #tpu.memory_space<vmem>>, vector<1x2x32xf32>,
    %c0_87 = arith.constant 0 : index
    %c0_88 = arith.constant 0 : index
    %327 = vector.load %arg7[%c0_87, %c0_88] : memref<32x96xbf16, #tpu.memory_space<vmem>>, vector<32x96xbf16>
    %c0_89 = arith.constant 0 : index
    %c0_90 = arith.constant 0 : index
    %328 = vector.load %arg8[%c0_89, %c0_90] : memref<32x96xbf16, #tpu.memory_space<vmem>>, vector<32x96xbf16>
    %c0_91 = arith.constant 0 : index
    %c0_92 = arith.constant 0 : index
    %329 = vector.load %arg9[%c0_91, %c0_92] : memref<1x96xf32, #tpu.memory_space<vmem>>, vector<1x96xf32>
    %c0_93 = arith.constant 0 : index
    %c0_94 = arith.constant 0 : index
    %330 = vector.load %arg10[%c0_93, %c0_94] : memref<1x32xf32, #tpu.memory_space<vmem>>, vector<1x32xf32>
    %331 = vector.shape_cast %330 : vector<1x32xf32> to vector<1x32xf32>
    %332 = vector.broadcast %331 : vector<1x32xf32> to vector<2x32xf32>
    %c0_95 = arith.constant 0 : index
    %c0_96 = arith.constant 0 : index
    %c0_97 = arith.constant 0 : index
    %333 = vector.load %arg16[%c0_95, %c0_96, %c0_97] : memref<8x2x32xbf16, #tpu.memory_space<vmem>>, vector<8x2x32xbf16>
    %334 = vector.shape_cast %333 : vector<8x2x32xbf16> to vector<16x32xbf16>
    %cst_98 = arith.constant dense<0.000000e+00> : vector<16x96xf32>
    %335 = tpu.matmul %334, %327, %cst_98 {dimension_numbers = #tpu.dot_dimension_numbers<[1], [0], [0], [1], [0, 0, 1, 1], [], []>} : vector<16x32xbf16>, vector<32x96xbf16>, vector<16x96xf32> -> vector<16x96xf32>
    %336 = vector.broadcast %329 : vector<1x96xf32> to vector<16x96xf32>
    %337 = arith.addf %335, %336 : vector<16x96xf32>
    %338 = vector.shape_cast %337 : vector<16x96xf32> to vector<8x2x96xf32>
    %c0_99 = arith.constant 0 : index
    %c0_100 = arith.constant 0 : index
    %c0_101 = arith.constant 0 : index
    %339 = vector.load %arg15[%c0_99, %c0_100, %c0_101] : memref<8x2x96xf32, #tpu.memory_space<vmem>>, vector<8x2x96xf32>
    tpu.vector_store %arg15[%c0_99, %c0_100, %c0_101], %338 {strides = array<i32>} : memref<8x2x96xf32, #tpu.memory_space<vmem>>, vector<8x2x96xf32>,
    %c1_102 = arith.constant 1 : index
    %c0_103 = arith.constant 0 : index
    %c0_104 = arith.constant 0 : index
    %340 = vector.load %arg14[%c1_102, %c0_103, %c0_104] : memref<2x2x32xf32, #tpu.memory_space<vmem>>, vector<1x2x32xf32>
    %341 = vector.shape_cast %340 : vector<1x2x32xf32> to vector<2x32xf32>
    %c0_i32_105 = arith.constant 0 : i32
    %342 = arith.index_cast %c0_i32_105 : i32 to index
    %c0_106 = arith.constant 0 : index
    %c0_107 = arith.constant 0 : index
    %343 = vector.load %arg15[%342, %c0_106, %c0_107] : memref<8x2x96xf32, #tpu.memory_space<vmem>>, vector<1x2x96xf32>
    %344 = vector.shape_cast %343 : vector<1x2x96xf32> to vector<2x96xf32>
    %345 = arith.truncf %341 : vector<2x32xf32> to vector<2x32xbf16>
    %cst_108 = arith.constant dense<0.000000e+00> : vector<2x96xf32>
    %346 = tpu.matmul %345, %328, %cst_108 {dimension_numbers = #tpu.dot_dimension_numbers<[1], [0], [0], [1], [0, 0, 1, 1], [], []>} : vector<2x32xbf16>, vector<32x96xbf16>, vector<2x96xf32> -> vector<2x96xf32>
    %347 = vector.extract_strided_slice %344 {offsets = [0, 0], sizes = [2, 32], strides = [1, 1]} : vector<2x96xf32> to vector<2x32xf32>
    %348 = vector.extract_strided_slice %346 {offsets = [0, 0], sizes = [2, 32], strides = [1, 1]} : vector<2x96xf32> to vector<2x32xf32>
    %349 = arith.addf %347, %348 : vector<2x32xf32>
    %350 = arith.negf %349 : vector<2x32xf32>
    %351 = math.exp %350 : vector<2x32xf32>
    %cst_109 = arith.constant 1.000000e+00 : f32
    %352 = vector.broadcast %cst_109 : f32 to vector<2x32xf32>
    %353 = arith.addf %352, %351 : vector<2x32xf32>
    %354 = arith.divf %352, %353 : vector<2x32xf32>
    %355 = vector.extract_strided_slice %344 {offsets = [0, 32], sizes = [2, 32], strides = [1, 1]} : vector<2x96xf32> to vector<2x32xf32>
    %356 = vector.extract_strided_slice %346 {offsets = [0, 32], sizes = [2, 32], strides = [1, 1]} : vector<2x96xf32> to vector<2x32xf32>
    %357 = arith.addf %355, %356 : vector<2x32xf32>
    %358 = arith.negf %357 : vector<2x32xf32>
    %359 = math.exp %358 : vector<2x32xf32>
    %cst_110 = arith.constant 1.000000e+00 : f32
    %360 = vector.broadcast %cst_110 : f32 to vector<2x32xf32>
    %361 = arith.addf %360, %359 : vector<2x32xf32>
    %362 = arith.divf %360, %361 : vector<2x32xf32>
    %363 = vector.extract_strided_slice %344 {offsets = [0, 64], sizes = [2, 32], strides = [1, 1]} : vector<2x96xf32> to vector<2x32xf32>
    %364 = vector.extract_strided_slice %346 {offsets = [0, 64], sizes = [2, 32], strides = [1, 1]} : vector<2x96xf32> to vector<2x32xf32>
    %365 = arith.addf %364, %332 : vector<2x32xf32>
    %366 = arith.mulf %354, %365 : vector<2x32xf32>
    %367 = arith.addf %363, %366 : vector<2x32xf32>
    %368 = math.tanh %367 : vector<2x32xf32>
    %cst_111 = arith.constant 1.000000e+00 : f32
    %369 = vector.broadcast %cst_111 : f32 to vector<2x32xf32>
    %370 = arith.subf %369, %362 : vector<2x32xf32>
    %371 = arith.mulf %370, %368 : vector<2x32xf32>
    %372 = arith.mulf %362, %341 : vector<2x32xf32>
    %373 = arith.addf %371, %372 : vector<2x32xf32>
    %374 = arith.truncf %373 : vector<2x32xf32> to vector<2x32xbf16>
    %375 = arith.index_cast %c0_i32_105 : i32 to index
    %c0_112 = arith.constant 0 : index
    %c0_113 = arith.constant 0 : index
    %376 = vector.load %arg16[%375, %c0_112, %c0_113] : memref<8x2x32xbf16, #tpu.memory_space<vmem>>, vector<1x2x32xbf16>
    %377 = vector.shape_cast %376 : vector<1x2x32xbf16> to vector<2x32xbf16>
    %378 = vector.shape_cast %374 : vector<2x32xbf16> to vector<1x2x32xbf16>
    tpu.vector_store %arg16[%375, %c0_112, %c0_113], %378 {strides = array<i32>} : memref<8x2x32xbf16, #tpu.memory_space<vmem>>, vector<1x2x32xbf16>,
    %c1_i32_114 = arith.constant 1 : i32
    %379 = arith.index_cast %c1_i32_114 : i32 to index
    %c0_115 = arith.constant 0 : index
    %c0_116 = arith.constant 0 : index
    %380 = vector.load %arg15[%379, %c0_115, %c0_116] : memref<8x2x96xf32, #tpu.memory_space<vmem>>, vector<1x2x96xf32>
    %381 = vector.shape_cast %380 : vector<1x2x96xf32> to vector<2x96xf32>
    %382 = arith.truncf %373 : vector<2x32xf32> to vector<2x32xbf16>
    %cst_117 = arith.constant dense<0.000000e+00> : vector<2x96xf32>
    %383 = tpu.matmul %382, %328, %cst_117 {dimension_numbers = #tpu.dot_dimension_numbers<[1], [0], [0], [1], [0, 0, 1, 1], [], []>} : vector<2x32xbf16>, vector<32x96xbf16>, vector<2x96xf32> -> vector<2x96xf32>
    %384 = vector.extract_strided_slice %381 {offsets = [0, 0], sizes = [2, 32], strides = [1, 1]} : vector<2x96xf32> to vector<2x32xf32>
    %385 = vector.extract_strided_slice %383 {offsets = [0, 0], sizes = [2, 32], strides = [1, 1]} : vector<2x96xf32> to vector<2x32xf32>
    %386 = arith.addf %384, %385 : vector<2x32xf32>
    %387 = arith.negf %386 : vector<2x32xf32>
    %388 = math.exp %387 : vector<2x32xf32>
    %cst_118 = arith.constant 1.000000e+00 : f32
    %389 = vector.broadcast %cst_118 : f32 to vector<2x32xf32>
    %390 = arith.addf %389, %388 : vector<2x32xf32>
    %391 = arith.divf %389, %390 : vector<2x32xf32>
    %392 = vector.extract_strided_slice %381 {offsets = [0, 32], sizes = [2, 32], strides = [1, 1]} : vector<2x96xf32> to vector<2x32xf32>
    %393 = vector.extract_strided_slice %383 {offsets = [0, 32], sizes = [2, 32], strides = [1, 1]} : vector<2x96xf32> to vector<2x32xf32>
    %394 = arith.addf %392, %393 : vector<2x32xf32>
    %395 = arith.negf %394 : vector<2x32xf32>
    %396 = math.exp %395 : vector<2x32xf32>
    %cst_119 = arith.constant 1.000000e+00 : f32
    %397 = vector.broadcast %cst_119 : f32 to vector<2x32xf32>
    %398 = arith.addf %397, %396 : vector<2x32xf32>
    %399 = arith.divf %397, %398 : vector<2x32xf32>
    %400 = vector.extract_strided_slice %381 {offsets = [0, 64], sizes = [2, 32], strides = [1, 1]} : vector<2x96xf32> to vector<2x32xf32>
    %401 = vector.extract_strided_slice %383 {offsets = [0, 64], sizes = [2, 32], strides = [1, 1]} : vector<2x96xf32> to vector<2x32xf32>
    %402 = arith.addf %401, %332 : vector<2x32xf32>
    %403 = arith.mulf %391, %402 : vector<2x32xf32>
    %404 = arith.addf %400, %403 : vector<2x32xf32>
    %405 = math.tanh %404 : vector<2x32xf32>
    %cst_120 = arith.constant 1.000000e+00 : f32
    %406 = vector.broadcast %cst_120 : f32 to vector<2x32xf32>
    %407 = arith.subf %406, %399 : vector<2x32xf32>
    %408 = arith.mulf %407, %405 : vector<2x32xf32>
    %409 = arith.mulf %399, %373 : vector<2x32xf32>
    %410 = arith.addf %408, %409 : vector<2x32xf32>
    %411 = arith.truncf %410 : vector<2x32xf32> to vector<2x32xbf16>
    %412 = arith.index_cast %c1_i32_114 : i32 to index
    %c0_121 = arith.constant 0 : index
    %c0_122 = arith.constant 0 : index
    %413 = vector.load %arg16[%412, %c0_121, %c0_122] : memref<8x2x32xbf16, #tpu.memory_space<vmem>>, vector<1x2x32xbf16>
    %414 = vector.shape_cast %413 : vector<1x2x32xbf16> to vector<2x32xbf16>
    %415 = vector.shape_cast %411 : vector<2x32xbf16> to vector<1x2x32xbf16>
    tpu.vector_store %arg16[%412, %c0_121, %c0_122], %415 {strides = array<i32>} : memref<8x2x32xbf16, #tpu.memory_space<vmem>>, vector<1x2x32xbf16>,
    %c2_i32_123 = arith.constant 2 : i32
    %416 = arith.index_cast %c2_i32_123 : i32 to index
    %c0_124 = arith.constant 0 : index
    %c0_125 = arith.constant 0 : index
    %417 = vector.load %arg15[%416, %c0_124, %c0_125] : memref<8x2x96xf32, #tpu.memory_space<vmem>>, vector<1x2x96xf32>
    %418 = vector.shape_cast %417 : vector<1x2x96xf32> to vector<2x96xf32>
    %419 = arith.truncf %410 : vector<2x32xf32> to vector<2x32xbf16>
    %cst_126 = arith.constant dense<0.000000e+00> : vector<2x96xf32>
    %420 = tpu.matmul %419, %328, %cst_126 {dimension_numbers = #tpu.dot_dimension_numbers<[1], [0], [0], [1], [0, 0, 1, 1], [], []>} : vector<2x32xbf16>, vector<32x96xbf16>, vector<2x96xf32> -> vector<2x96xf32>
    %421 = vector.extract_strided_slice %418 {offsets = [0, 0], sizes = [2, 32], strides = [1, 1]} : vector<2x96xf32> to vector<2x32xf32>
    %422 = vector.extract_strided_slice %420 {offsets = [0, 0], sizes = [2, 32], strides = [1, 1]} : vector<2x96xf32> to vector<2x32xf32>
    %423 = arith.addf %421, %422 : vector<2x32xf32>
    %424 = arith.negf %423 : vector<2x32xf32>
    %425 = math.exp %424 : vector<2x32xf32>
    %cst_127 = arith.constant 1.000000e+00 : f32
    %426 = vector.broadcast %cst_127 : f32 to vector<2x32xf32>
    %427 = arith.addf %426, %425 : vector<2x32xf32>
    %428 = arith.divf %426, %427 : vector<2x32xf32>
    %429 = vector.extract_strided_slice %418 {offsets = [0, 32], sizes = [2, 32], strides = [1, 1]} : vector<2x96xf32> to vector<2x32xf32>
    %430 = vector.extract_strided_slice %420 {offsets = [0, 32], sizes = [2, 32], strides = [1, 1]} : vector<2x96xf32> to vector<2x32xf32>
    %431 = arith.addf %429, %430 : vector<2x32xf32>
    %432 = arith.negf %431 : vector<2x32xf32>
    %433 = math.exp %432 : vector<2x32xf32>
    %cst_128 = arith.constant 1.000000e+00 : f32
    %434 = vector.broadcast %cst_128 : f32 to vector<2x32xf32>
    %435 = arith.addf %434, %433 : vector<2x32xf32>
    %436 = arith.divf %434, %435 : vector<2x32xf32>
    %437 = vector.extract_strided_slice %418 {offsets = [0, 64], sizes = [2, 32], strides = [1, 1]} : vector<2x96xf32> to vector<2x32xf32>
    %438 = vector.extract_strided_slice %420 {offsets = [0, 64], sizes = [2, 32], strides = [1, 1]} : vector<2x96xf32> to vector<2x32xf32>
    %439 = arith.addf %438, %332 : vector<2x32xf32>
    %440 = arith.mulf %428, %439 : vector<2x32xf32>
    %441 = arith.addf %437, %440 : vector<2x32xf32>
    %442 = math.tanh %441 : vector<2x32xf32>
    %cst_129 = arith.constant 1.000000e+00 : f32
    %443 = vector.broadcast %cst_129 : f32 to vector<2x32xf32>
    %444 = arith.subf %443, %436 : vector<2x32xf32>
    %445 = arith.mulf %444, %442 : vector<2x32xf32>
    %446 = arith.mulf %436, %410 : vector<2x32xf32>
    %447 = arith.addf %445, %446 : vector<2x32xf32>
    %448 = arith.truncf %447 : vector<2x32xf32> to vector<2x32xbf16>
    %449 = arith.index_cast %c2_i32_123 : i32 to index
    %c0_130 = arith.constant 0 : index
    %c0_131 = arith.constant 0 : index
    %450 = vector.load %arg16[%449, %c0_130, %c0_131] : memref<8x2x32xbf16, #tpu.memory_space<vmem>>, vector<1x2x32xbf16>
    %451 = vector.shape_cast %450 : vector<1x2x32xbf16> to vector<2x32xbf16>
    %452 = vector.shape_cast %448 : vector<2x32xbf16> to vector<1x2x32xbf16>
    tpu.vector_store %arg16[%449, %c0_130, %c0_131], %452 {strides = array<i32>} : memref<8x2x32xbf16, #tpu.memory_space<vmem>>, vector<1x2x32xbf16>,
    %c3_i32_132 = arith.constant 3 : i32
    %453 = arith.index_cast %c3_i32_132 : i32 to index
    %c0_133 = arith.constant 0 : index
    %c0_134 = arith.constant 0 : index
    %454 = vector.load %arg15[%453, %c0_133, %c0_134] : memref<8x2x96xf32, #tpu.memory_space<vmem>>, vector<1x2x96xf32>
    %455 = vector.shape_cast %454 : vector<1x2x96xf32> to vector<2x96xf32>
    %456 = arith.truncf %447 : vector<2x32xf32> to vector<2x32xbf16>
    %cst_135 = arith.constant dense<0.000000e+00> : vector<2x96xf32>
    %457 = tpu.matmul %456, %328, %cst_135 {dimension_numbers = #tpu.dot_dimension_numbers<[1], [0], [0], [1], [0, 0, 1, 1], [], []>} : vector<2x32xbf16>, vector<32x96xbf16>, vector<2x96xf32> -> vector<2x96xf32>
    %458 = vector.extract_strided_slice %455 {offsets = [0, 0], sizes = [2, 32], strides = [1, 1]} : vector<2x96xf32> to vector<2x32xf32>
    %459 = vector.extract_strided_slice %457 {offsets = [0, 0], sizes = [2, 32], strides = [1, 1]} : vector<2x96xf32> to vector<2x32xf32>
    %460 = arith.addf %458, %459 : vector<2x32xf32>
    %461 = arith.negf %460 : vector<2x32xf32>
    %462 = math.exp %461 : vector<2x32xf32>
    %cst_136 = arith.constant 1.000000e+00 : f32
    %463 = vector.broadcast %cst_136 : f32 to vector<2x32xf32>
    %464 = arith.addf %463, %462 : vector<2x32xf32>
    %465 = arith.divf %463, %464 : vector<2x32xf32>
    %466 = vector.extract_strided_slice %455 {offsets = [0, 32], sizes = [2, 32], strides = [1, 1]} : vector<2x96xf32> to vector<2x32xf32>
    %467 = vector.extract_strided_slice %457 {offsets = [0, 32], sizes = [2, 32], strides = [1, 1]} : vector<2x96xf32> to vector<2x32xf32>
    %468 = arith.addf %466, %467 : vector<2x32xf32>
    %469 = arith.negf %468 : vector<2x32xf32>
    %470 = math.exp %469 : vector<2x32xf32>
    %cst_137 = arith.constant 1.000000e+00 : f32
    %471 = vector.broadcast %cst_137 : f32 to vector<2x32xf32>
    %472 = arith.addf %471, %470 : vector<2x32xf32>
    %473 = arith.divf %471, %472 : vector<2x32xf32>
    %474 = vector.extract_strided_slice %455 {offsets = [0, 64], sizes = [2, 32], strides = [1, 1]} : vector<2x96xf32> to vector<2x32xf32>
    %475 = vector.extract_strided_slice %457 {offsets = [0, 64], sizes = [2, 32], strides = [1, 1]} : vector<2x96xf32> to vector<2x32xf32>
    %476 = arith.addf %475, %332 : vector<2x32xf32>
    %477 = arith.mulf %465, %476 : vector<2x32xf32>
    %478 = arith.addf %474, %477 : vector<2x32xf32>
    %479 = math.tanh %478 : vector<2x32xf32>
    %cst_138 = arith.constant 1.000000e+00 : f32
    %480 = vector.broadcast %cst_138 : f32 to vector<2x32xf32>
    %481 = arith.subf %480, %473 : vector<2x32xf32>
    %482 = arith.mulf %481, %479 : vector<2x32xf32>
    %483 = arith.mulf %473, %447 : vector<2x32xf32>
    %484 = arith.addf %482, %483 : vector<2x32xf32>
    %485 = arith.truncf %484 : vector<2x32xf32> to vector<2x32xbf16>
    %486 = arith.index_cast %c3_i32_132 : i32 to index
    %c0_139 = arith.constant 0 : index
    %c0_140 = arith.constant 0 : index
    %487 = vector.load %arg16[%486, %c0_139, %c0_140] : memref<8x2x32xbf16, #tpu.memory_space<vmem>>, vector<1x2x32xbf16>
    %488 = vector.shape_cast %487 : vector<1x2x32xbf16> to vector<2x32xbf16>
    %489 = vector.shape_cast %485 : vector<2x32xbf16> to vector<1x2x32xbf16>
    tpu.vector_store %arg16[%486, %c0_139, %c0_140], %489 {strides = array<i32>} : memref<8x2x32xbf16, #tpu.memory_space<vmem>>, vector<1x2x32xbf16>,
    %c4_i32_141 = arith.constant 4 : i32
    %490 = arith.index_cast %c4_i32_141 : i32 to index
    %c0_142 = arith.constant 0 : index
    %c0_143 = arith.constant 0 : index
    %491 = vector.load %arg15[%490, %c0_142, %c0_143] : memref<8x2x96xf32, #tpu.memory_space<vmem>>, vector<1x2x96xf32>
    %492 = vector.shape_cast %491 : vector<1x2x96xf32> to vector<2x96xf32>
    %493 = arith.truncf %484 : vector<2x32xf32> to vector<2x32xbf16>
    %cst_144 = arith.constant dense<0.000000e+00> : vector<2x96xf32>
    %494 = tpu.matmul %493, %328, %cst_144 {dimension_numbers = #tpu.dot_dimension_numbers<[1], [0], [0], [1], [0, 0, 1, 1], [], []>} : vector<2x32xbf16>, vector<32x96xbf16>, vector<2x96xf32> -> vector<2x96xf32>
    %495 = vector.extract_strided_slice %492 {offsets = [0, 0], sizes = [2, 32], strides = [1, 1]} : vector<2x96xf32> to vector<2x32xf32>
    %496 = vector.extract_strided_slice %494 {offsets = [0, 0], sizes = [2, 32], strides = [1, 1]} : vector<2x96xf32> to vector<2x32xf32>
    %497 = arith.addf %495, %496 : vector<2x32xf32>
    %498 = arith.negf %497 : vector<2x32xf32>
    %499 = math.exp %498 : vector<2x32xf32>
    %cst_145 = arith.constant 1.000000e+00 : f32
    %500 = vector.broadcast %cst_145 : f32 to vector<2x32xf32>
    %501 = arith.addf %500, %499 : vector<2x32xf32>
    %502 = arith.divf %500, %501 : vector<2x32xf32>
    %503 = vector.extract_strided_slice %492 {offsets = [0, 32], sizes = [2, 32], strides = [1, 1]} : vector<2x96xf32> to vector<2x32xf32>
    %504 = vector.extract_strided_slice %494 {offsets = [0, 32], sizes = [2, 32], strides = [1, 1]} : vector<2x96xf32> to vector<2x32xf32>
    %505 = arith.addf %503, %504 : vector<2x32xf32>
    %506 = arith.negf %505 : vector<2x32xf32>
    %507 = math.exp %506 : vector<2x32xf32>
    %cst_146 = arith.constant 1.000000e+00 : f32
    %508 = vector.broadcast %cst_146 : f32 to vector<2x32xf32>
    %509 = arith.addf %508, %507 : vector<2x32xf32>
    %510 = arith.divf %508, %509 : vector<2x32xf32>
    %511 = vector.extract_strided_slice %492 {offsets = [0, 64], sizes = [2, 32], strides = [1, 1]} : vector<2x96xf32> to vector<2x32xf32>
    %512 = vector.extract_strided_slice %494 {offsets = [0, 64], sizes = [2, 32], strides = [1, 1]} : vector<2x96xf32> to vector<2x32xf32>
    %513 = arith.addf %512, %332 : vector<2x32xf32>
    %514 = arith.mulf %502, %513 : vector<2x32xf32>
    %515 = arith.addf %511, %514 : vector<2x32xf32>
    %516 = math.tanh %515 : vector<2x32xf32>
    %cst_147 = arith.constant 1.000000e+00 : f32
    %517 = vector.broadcast %cst_147 : f32 to vector<2x32xf32>
    %518 = arith.subf %517, %510 : vector<2x32xf32>
    %519 = arith.mulf %518, %516 : vector<2x32xf32>
    %520 = arith.mulf %510, %484 : vector<2x32xf32>
    %521 = arith.addf %519, %520 : vector<2x32xf32>
    %522 = arith.truncf %521 : vector<2x32xf32> to vector<2x32xbf16>
    %523 = arith.index_cast %c4_i32_141 : i32 to index
    %c0_148 = arith.constant 0 : index
    %c0_149 = arith.constant 0 : index
    %524 = vector.load %arg16[%523, %c0_148, %c0_149] : memref<8x2x32xbf16, #tpu.memory_space<vmem>>, vector<1x2x32xbf16>
    %525 = vector.shape_cast %524 : vector<1x2x32xbf16> to vector<2x32xbf16>
    %526 = vector.shape_cast %522 : vector<2x32xbf16> to vector<1x2x32xbf16>
    tpu.vector_store %arg16[%523, %c0_148, %c0_149], %526 {strides = array<i32>} : memref<8x2x32xbf16, #tpu.memory_space<vmem>>, vector<1x2x32xbf16>,
    %c5_i32_150 = arith.constant 5 : i32
    %527 = arith.index_cast %c5_i32_150 : i32 to index
    %c0_151 = arith.constant 0 : index
    %c0_152 = arith.constant 0 : index
    %528 = vector.load %arg15[%527, %c0_151, %c0_152] : memref<8x2x96xf32, #tpu.memory_space<vmem>>, vector<1x2x96xf32>
    %529 = vector.shape_cast %528 : vector<1x2x96xf32> to vector<2x96xf32>
    %530 = arith.truncf %521 : vector<2x32xf32> to vector<2x32xbf16>
    %cst_153 = arith.constant dense<0.000000e+00> : vector<2x96xf32>
    %531 = tpu.matmul %530, %328, %cst_153 {dimension_numbers = #tpu.dot_dimension_numbers<[1], [0], [0], [1], [0, 0, 1, 1], [], []>} : vector<2x32xbf16>, vector<32x96xbf16>, vector<2x96xf32> -> vector<2x96xf32>
    %532 = vector.extract_strided_slice %529 {offsets = [0, 0], sizes = [2, 32], strides = [1, 1]} : vector<2x96xf32> to vector<2x32xf32>
    %533 = vector.extract_strided_slice %531 {offsets = [0, 0], sizes = [2, 32], strides = [1, 1]} : vector<2x96xf32> to vector<2x32xf32>
    %534 = arith.addf %532, %533 : vector<2x32xf32>
    %535 = arith.negf %534 : vector<2x32xf32>
    %536 = math.exp %535 : vector<2x32xf32>
    %cst_154 = arith.constant 1.000000e+00 : f32
    %537 = vector.broadcast %cst_154 : f32 to vector<2x32xf32>
    %538 = arith.addf %537, %536 : vector<2x32xf32>
    %539 = arith.divf %537, %538 : vector<2x32xf32>
    %540 = vector.extract_strided_slice %529 {offsets = [0, 32], sizes = [2, 32], strides = [1, 1]} : vector<2x96xf32> to vector<2x32xf32>
    %541 = vector.extract_strided_slice %531 {offsets = [0, 32], sizes = [2, 32], strides = [1, 1]} : vector<2x96xf32> to vector<2x32xf32>
    %542 = arith.addf %540, %541 : vector<2x32xf32>
    %543 = arith.negf %542 : vector<2x32xf32>
    %544 = math.exp %543 : vector<2x32xf32>
    %cst_155 = arith.constant 1.000000e+00 : f32
    %545 = vector.broadcast %cst_155 : f32 to vector<2x32xf32>
    %546 = arith.addf %545, %544 : vector<2x32xf32>
    %547 = arith.divf %545, %546 : vector<2x32xf32>
    %548 = vector.extract_strided_slice %529 {offsets = [0, 64], sizes = [2, 32], strides = [1, 1]} : vector<2x96xf32> to vector<2x32xf32>
    %549 = vector.extract_strided_slice %531 {offsets = [0, 64], sizes = [2, 32], strides = [1, 1]} : vector<2x96xf32> to vector<2x32xf32>
    %550 = arith.addf %549, %332 : vector<2x32xf32>
    %551 = arith.mulf %539, %550 : vector<2x32xf32>
    %552 = arith.addf %548, %551 : vector<2x32xf32>
    %553 = math.tanh %552 : vector<2x32xf32>
    %cst_156 = arith.constant 1.000000e+00 : f32
    %554 = vector.broadcast %cst_156 : f32 to vector<2x32xf32>
    %555 = arith.subf %554, %547 : vector<2x32xf32>
    %556 = arith.mulf %555, %553 : vector<2x32xf32>
    %557 = arith.mulf %547, %521 : vector<2x32xf32>
    %558 = arith.addf %556, %557 : vector<2x32xf32>
    %559 = arith.truncf %558 : vector<2x32xf32> to vector<2x32xbf16>
    %560 = arith.index_cast %c5_i32_150 : i32 to index
    %c0_157 = arith.constant 0 : index
    %c0_158 = arith.constant 0 : index
    %561 = vector.load %arg16[%560, %c0_157, %c0_158] : memref<8x2x32xbf16, #tpu.memory_space<vmem>>, vector<1x2x32xbf16>
    %562 = vector.shape_cast %561 : vector<1x2x32xbf16> to vector<2x32xbf16>
    %563 = vector.shape_cast %559 : vector<2x32xbf16> to vector<1x2x32xbf16>
    tpu.vector_store %arg16[%560, %c0_157, %c0_158], %563 {strides = array<i32>} : memref<8x2x32xbf16, #tpu.memory_space<vmem>>, vector<1x2x32xbf16>,
    %c6_i32_159 = arith.constant 6 : i32
    %564 = arith.index_cast %c6_i32_159 : i32 to index
    %c0_160 = arith.constant 0 : index
    %c0_161 = arith.constant 0 : index
    %565 = vector.load %arg15[%564, %c0_160, %c0_161] : memref<8x2x96xf32, #tpu.memory_space<vmem>>, vector<1x2x96xf32>
    %566 = vector.shape_cast %565 : vector<1x2x96xf32> to vector<2x96xf32>
    %567 = arith.truncf %558 : vector<2x32xf32> to vector<2x32xbf16>
    %cst_162 = arith.constant dense<0.000000e+00> : vector<2x96xf32>
    %568 = tpu.matmul %567, %328, %cst_162 {dimension_numbers = #tpu.dot_dimension_numbers<[1], [0], [0], [1], [0, 0, 1, 1], [], []>} : vector<2x32xbf16>, vector<32x96xbf16>, vector<2x96xf32> -> vector<2x96xf32>
    %569 = vector.extract_strided_slice %566 {offsets = [0, 0], sizes = [2, 32], strides = [1, 1]} : vector<2x96xf32> to vector<2x32xf32>
    %570 = vector.extract_strided_slice %568 {offsets = [0, 0], sizes = [2, 32], strides = [1, 1]} : vector<2x96xf32> to vector<2x32xf32>
    %571 = arith.addf %569, %570 : vector<2x32xf32>
    %572 = arith.negf %571 : vector<2x32xf32>
    %573 = math.exp %572 : vector<2x32xf32>
    %cst_163 = arith.constant 1.000000e+00 : f32
    %574 = vector.broadcast %cst_163 : f32 to vector<2x32xf32>
    %575 = arith.addf %574, %573 : vector<2x32xf32>
    %576 = arith.divf %574, %575 : vector<2x32xf32>
    %577 = vector.extract_strided_slice %566 {offsets = [0, 32], sizes = [2, 32], strides = [1, 1]} : vector<2x96xf32> to vector<2x32xf32>
    %578 = vector.extract_strided_slice %568 {offsets = [0, 32], sizes = [2, 32], strides = [1, 1]} : vector<2x96xf32> to vector<2x32xf32>
    %579 = arith.addf %577, %578 : vector<2x32xf32>
    %580 = arith.negf %579 : vector<2x32xf32>
    %581 = math.exp %580 : vector<2x32xf32>
    %cst_164 = arith.constant 1.000000e+00 : f32
    %582 = vector.broadcast %cst_164 : f32 to vector<2x32xf32>
    %583 = arith.addf %582, %581 : vector<2x32xf32>
    %584 = arith.divf %582, %583 : vector<2x32xf32>
    %585 = vector.extract_strided_slice %566 {offsets = [0, 64], sizes = [2, 32], strides = [1, 1]} : vector<2x96xf32> to vector<2x32xf32>
    %586 = vector.extract_strided_slice %568 {offsets = [0, 64], sizes = [2, 32], strides = [1, 1]} : vector<2x96xf32> to vector<2x32xf32>
    %587 = arith.addf %586, %332 : vector<2x32xf32>
    %588 = arith.mulf %576, %587 : vector<2x32xf32>
    %589 = arith.addf %585, %588 : vector<2x32xf32>
    %590 = math.tanh %589 : vector<2x32xf32>
    %cst_165 = arith.constant 1.000000e+00 : f32
    %591 = vector.broadcast %cst_165 : f32 to vector<2x32xf32>
    %592 = arith.subf %591, %584 : vector<2x32xf32>
    %593 = arith.mulf %592, %590 : vector<2x32xf32>
    %594 = arith.mulf %584, %558 : vector<2x32xf32>
    %595 = arith.addf %593, %594 : vector<2x32xf32>
    %596 = arith.truncf %595 : vector<2x32xf32> to vector<2x32xbf16>
    %597 = arith.index_cast %c6_i32_159 : i32 to index
    %c0_166 = arith.constant 0 : index
    %c0_167 = arith.constant 0 : index
    %598 = vector.load %arg16[%597, %c0_166, %c0_167] : memref<8x2x32xbf16, #tpu.memory_space<vmem>>, vector<1x2x32xbf16>
    %599 = vector.shape_cast %598 : vector<1x2x32xbf16> to vector<2x32xbf16>
    %600 = vector.shape_cast %596 : vector<2x32xbf16> to vector<1x2x32xbf16>
    tpu.vector_store %arg16[%597, %c0_166, %c0_167], %600 {strides = array<i32>} : memref<8x2x32xbf16, #tpu.memory_space<vmem>>, vector<1x2x32xbf16>,
    %c7_i32_168 = arith.constant 7 : i32
    %601 = arith.index_cast %c7_i32_168 : i32 to index
    %c0_169 = arith.constant 0 : index
    %c0_170 = arith.constant 0 : index
    %602 = vector.load %arg15[%601, %c0_169, %c0_170] : memref<8x2x96xf32, #tpu.memory_space<vmem>>, vector<1x2x96xf32>
    %603 = vector.shape_cast %602 : vector<1x2x96xf32> to vector<2x96xf32>
    %604 = arith.truncf %595 : vector<2x32xf32> to vector<2x32xbf16>
    %cst_171 = arith.constant dense<0.000000e+00> : vector<2x96xf32>
    %605 = tpu.matmul %604, %328, %cst_171 {dimension_numbers = #tpu.dot_dimension_numbers<[1], [0], [0], [1], [0, 0, 1, 1], [], []>} : vector<2x32xbf16>, vector<32x96xbf16>, vector<2x96xf32> -> vector<2x96xf32>
    %606 = vector.extract_strided_slice %603 {offsets = [0, 0], sizes = [2, 32], strides = [1, 1]} : vector<2x96xf32> to vector<2x32xf32>
    %607 = vector.extract_strided_slice %605 {offsets = [0, 0], sizes = [2, 32], strides = [1, 1]} : vector<2x96xf32> to vector<2x32xf32>
    %608 = arith.addf %606, %607 : vector<2x32xf32>
    %609 = arith.negf %608 : vector<2x32xf32>
    %610 = math.exp %609 : vector<2x32xf32>
    %cst_172 = arith.constant 1.000000e+00 : f32
    %611 = vector.broadcast %cst_172 : f32 to vector<2x32xf32>
    %612 = arith.addf %611, %610 : vector<2x32xf32>
    %613 = arith.divf %611, %612 : vector<2x32xf32>
    %614 = vector.extract_strided_slice %603 {offsets = [0, 32], sizes = [2, 32], strides = [1, 1]} : vector<2x96xf32> to vector<2x32xf32>
    %615 = vector.extract_strided_slice %605 {offsets = [0, 32], sizes = [2, 32], strides = [1, 1]} : vector<2x96xf32> to vector<2x32xf32>
    %616 = arith.addf %614, %615 : vector<2x32xf32>
    %617 = arith.negf %616 : vector<2x32xf32>
    %618 = math.exp %617 : vector<2x32xf32>
    %cst_173 = arith.constant 1.000000e+00 : f32
    %619 = vector.broadcast %cst_173 : f32 to vector<2x32xf32>
    %620 = arith.addf %619, %618 : vector<2x32xf32>
    %621 = arith.divf %619, %620 : vector<2x32xf32>
    %622 = vector.extract_strided_slice %603 {offsets = [0, 64], sizes = [2, 32], strides = [1, 1]} : vector<2x96xf32> to vector<2x32xf32>
    %623 = vector.extract_strided_slice %605 {offsets = [0, 64], sizes = [2, 32], strides = [1, 1]} : vector<2x96xf32> to vector<2x32xf32>
    %624 = arith.addf %623, %332 : vector<2x32xf32>
    %625 = arith.mulf %613, %624 : vector<2x32xf32>
    %626 = arith.addf %622, %625 : vector<2x32xf32>
    %627 = math.tanh %626 : vector<2x32xf32>
    %cst_174 = arith.constant 1.000000e+00 : f32
    %628 = vector.broadcast %cst_174 : f32 to vector<2x32xf32>
    %629 = arith.subf %628, %621 : vector<2x32xf32>
    %630 = arith.mulf %629, %627 : vector<2x32xf32>
    %631 = arith.mulf %621, %595 : vector<2x32xf32>
    %632 = arith.addf %630, %631 : vector<2x32xf32>
    %633 = arith.truncf %632 : vector<2x32xf32> to vector<2x32xbf16>
    %634 = arith.index_cast %c7_i32_168 : i32 to index
    %c0_175 = arith.constant 0 : index
    %c0_176 = arith.constant 0 : index
    %635 = vector.load %arg16[%634, %c0_175, %c0_176] : memref<8x2x32xbf16, #tpu.memory_space<vmem>>, vector<1x2x32xbf16>
    %636 = vector.shape_cast %635 : vector<1x2x32xbf16> to vector<2x32xbf16>
    %637 = vector.shape_cast %633 : vector<2x32xbf16> to vector<1x2x32xbf16>
    tpu.vector_store %arg16[%634, %c0_175, %c0_176], %637 {strides = array<i32>} : memref<8x2x32xbf16, #tpu.memory_space<vmem>>, vector<1x2x32xbf16>,
    %c8_i32_177 = arith.constant 8 : i32
    %c1_178 = arith.constant 1 : index
    %c0_179 = arith.constant 0 : index
    %c0_180 = arith.constant 0 : index
    %638 = vector.load %arg14[%c1_178, %c0_179, %c0_180] : memref<2x2x32xf32, #tpu.memory_space<vmem>>, vector<1x2x32xf32>
    %639 = vector.shape_cast %638 : vector<1x2x32xf32> to vector<2x32xf32>
    %640 = vector.shape_cast %632 : vector<2x32xf32> to vector<1x2x32xf32>
    tpu.vector_store %arg14[%c1_178, %c0_179, %c0_180], %640 {strides = array<i32>} : memref<2x2x32xf32, #tpu.memory_space<vmem>>, vector<1x2x32xf32>,
    %c0_181 = arith.constant 0 : index
    %c0_182 = arith.constant 0 : index
    %641 = vector.load %arg11[%c0_181, %c0_182] : memref<32x24xbf16, #tpu.memory_space<vmem>>, vector<32x24xbf16>
    %c0_183 = arith.constant 0 : index
    %c0_184 = arith.constant 0 : index
    %642 = vector.load %arg12[%c0_183, %c0_184] : memref<1x24xf32, #tpu.memory_space<vmem>>, vector<1x24xf32>
    %c0_185 = arith.constant 0 : index
    %c0_186 = arith.constant 0 : index
    %c0_187 = arith.constant 0 : index
    %643 = vector.load %arg16[%c0_185, %c0_186, %c0_187] : memref<8x2x32xbf16, #tpu.memory_space<vmem>>, vector<8x2x32xbf16>
    %644 = vector.shape_cast %643 : vector<8x2x32xbf16> to vector<16x32xbf16>
    %cst_188 = arith.constant dense<0.000000e+00> : vector<16x24xf32>
    %645 = tpu.matmul %644, %641, %cst_188 {dimension_numbers = #tpu.dot_dimension_numbers<[1], [0], [0], [1], [0, 0, 1, 1], [], []>} : vector<16x32xbf16>, vector<32x24xbf16>, vector<16x24xf32> -> vector<16x24xf32>
    %646 = vector.broadcast %642 : vector<1x24xf32> to vector<16x24xf32>
    %647 = arith.addf %645, %646 : vector<16x24xf32>
    %648 = vector.shape_cast %647 : vector<16x24xf32> to vector<8x2x24xf32>
    %649 = vector.extract_strided_slice %648 {offsets = [0, 0, 0], sizes = [8, 1, 24], strides = [1, 1, 1]} : vector<8x2x24xf32> to vector<8x1x24xf32>
    %650 = vector.shape_cast %649 : vector<8x1x24xf32> to vector<8x24xf32>
    %c0_189 = arith.constant 0 : index
    %c0_190 = arith.constant 0 : index
    %c0_191 = arith.constant 0 : index
    %651 = vector.load %arg13[%c0_189, %c0_190, %c0_191] : memref<2x8x24xf32, #tpu.memory_space<vmem>>, vector<1x8x24xf32>
    %652 = vector.shape_cast %651 : vector<1x8x24xf32> to vector<8x24xf32>
    %653 = vector.shape_cast %650 : vector<8x24xf32> to vector<1x8x24xf32>
    tpu.vector_store %arg13[%c0_189, %c0_190, %c0_191], %653 {strides = array<i32>} : memref<2x8x24xf32, #tpu.memory_space<vmem>>, vector<1x8x24xf32>,
    %654 = vector.extract_strided_slice %648 {offsets = [0, 1, 0], sizes = [8, 1, 24], strides = [1, 1, 1]} : vector<8x2x24xf32> to vector<8x1x24xf32>
    %655 = vector.shape_cast %654 : vector<8x1x24xf32> to vector<8x24xf32>
    %c1_192 = arith.constant 1 : index
    %c0_193 = arith.constant 0 : index
    %c0_194 = arith.constant 0 : index
    %656 = vector.load %arg13[%c1_192, %c0_193, %c0_194] : memref<2x8x24xf32, #tpu.memory_space<vmem>>, vector<1x8x24xf32>
    %657 = vector.shape_cast %656 : vector<1x8x24xf32> to vector<8x24xf32>
    %658 = vector.shape_cast %655 : vector<8x24xf32> to vector<1x8x24xf32>
    tpu.vector_store %arg13[%c1_192, %c0_193, %c0_194], %658 {strides = array<i32>} : memref<2x8x24xf32, #tpu.memory_space<vmem>>, vector<1x8x24xf32>,
    return
  }
  func.func @transform_0(%arg0: i32, %arg1: i32) -> (i32, i32, i32) {
    %c0_i32 = arith.constant 0 : i32
    %c0_i32_0 = arith.constant 0 : i32
    return %arg0, %arg1, %c0_i32 : i32, i32, i32
  }
  func.func @transform_1(%arg0: i32, %arg1: i32) -> (i32, i32) {
    %c0_i32 = arith.constant 0 : i32
    %c0_i32_0 = arith.constant 0 : i32
    %c0_i32_1 = arith.constant 0 : i32
    return %c0_i32, %c0_i32_0 : i32, i32
  }
  func.func @transform_2(%arg0: i32, %arg1: i32) -> (i32, i32) {
    %c0_i32 = arith.constant 0 : i32
    %c0_i32_0 = arith.constant 0 : i32
    %c0_i32_1 = arith.constant 0 : i32
    return %c0_i32, %c0_i32_0 : i32, i32
  }
  func.func @transform_3(%arg0: i32, %arg1: i32) -> (i32, i32) {
    %c0_i32 = arith.constant 0 : i32
    %c0_i32_0 = arith.constant 0 : i32
    %c0_i32_1 = arith.constant 0 : i32
    return %c0_i32, %c0_i32_0 : i32, i32
  }
  func.func @transform_4(%arg0: i32, %arg1: i32) -> (i32, i32) {
    %c0_i32 = arith.constant 0 : i32
    %c0_i32_0 = arith.constant 0 : i32
    %c0_i32_1 = arith.constant 0 : i32
    return %c0_i32, %c0_i32_0 : i32, i32
  }
  func.func @transform_5(%arg0: i32, %arg1: i32) -> (i32, i32) {
    %c0_i32 = arith.constant 0 : i32
    %c0_i32_0 = arith.constant 0 : i32
    %c0_i32_1 = arith.constant 0 : i32
    return %c0_i32, %c0_i32_0 : i32, i32
  }
  func.func @transform_6(%arg0: i32, %arg1: i32) -> (i32, i32) {
    %c0_i32 = arith.constant 0 : i32
    %c0_i32_0 = arith.constant 0 : i32
    %c0_i32_1 = arith.constant 0 : i32
    return %c0_i32, %c0_i32_0 : i32, i32
  }
  func.func @transform_7(%arg0: i32, %arg1: i32) -> (i32, i32) {
    %c0_i32 = arith.constant 0 : i32
    %c0_i32_0 = arith.constant 0 : i32
    %c0_i32_1 = arith.constant 0 : i32
    return %c0_i32, %c0_i32_0 : i32, i32
  }
  func.func @transform_8(%arg0: i32, %arg1: i32) -> (i32, i32) {
    %c0_i32 = arith.constant 0 : i32
    %c0_i32_0 = arith.constant 0 : i32
    %c0_i32_1 = arith.constant 0 : i32
    return %c0_i32, %c0_i32_0 : i32, i32
  }
  func.func @transform_9(%arg0: i32, %arg1: i32) -> (i32, i32) {
    %c0_i32 = arith.constant 0 : i32
    %c0_i32_0 = arith.constant 0 : i32
    %c0_i32_1 = arith.constant 0 : i32
    return %c0_i32, %c0_i32_0 : i32, i32
  }
  func.func @transform_10(%arg0: i32, %arg1: i32) -> (i32, i32) {
    %c0_i32 = arith.constant 0 : i32
    %c0_i32_0 = arith.constant 0 : i32
    %c0_i32_1 = arith.constant 0 : i32
    return %c0_i32, %c0_i32_0 : i32, i32
  }
  func.func @transform_11(%arg0: i32, %arg1: i32) -> (i32, i32, i32) {
    %c0_i32 = arith.constant 0 : i32
    %c0_i32_0 = arith.constant 0 : i32
    return %arg0, %arg1, %c0_i32 : i32, i32, i32
  }
}

</mosaic_0001>

<bundles_post_ra>
// kernel: tpu_custom_call.1
= control target key start
LH: loop header
LB: loop body
LE: loop exit
PB: predicated region body
PF: predicated region fallthrough
CT: control target
= control target key end

     0   :  { %16 = vsyncpa [#allocation6], 0  ;;  %s3457_s0 = inlined_call_operand.vmem [shape: f32[2,8,16], index: 0, kind: input, shape index: {}]   ;;  %s3458_s1 = inlined_call_operand.hbm [shape: bf16[16,96], index: 1, kind: input, shape index: {}]   ;;  %s3459_s2 = inlined_call_operand.vmem [shape: bf16[32,96], index: 2, kind: input, shape index: {}]   ;;  %s3460_s3 = inlined_call_operand.vmem [shape: f32[1,96], index: 3, kind: input, shape index: {}]   ;;  %s3461_s4 = inlined_call_operand.vmem [shape: f32[1,32], index: 4, kind: input, shape index: {}]   ;;  %s3462_s5 = inlined_call_operand.hbm [shape: bf16[32,96], index: 5, kind: input, shape index: {}]   ;;  %s3463_s6 = inlined_call_operand.vmem [shape: bf16[32,96], index: 6, kind: input, shape index: {}]   ;;  %s3464_s7 = inlined_call_operand.hbm [shape: f32[1,96], index: 7, kind: input, shape index: {}]   ;;  %s3465_s8 = inlined_call_operand.hbm [shape: f32[1,32], index: 8, kind: input, shape index: {}]   ;;  %s3466_s9 = inlined_call_operand.vmem [shape: bf16[32,24], index: 9, kind: input, shape index: {}]   ;;  %s3467_s10 = inlined_call_operand.vmem [shape: f32[1,24], index: 10, kind: input, shape index: {}]   ;;  %s3468_s11 = inlined_call_operand.hbm [shape: f32[2,8,24], index: 11, kind: output, shape index: {}]  }
   0x1   :  { %17 = vsyncpa [#allocation9], 0 }
   0x2   :  { %18 = vsyncpa [#allocation12], 0 }
   0x3   :  { %19 = vsyncpa [#allocation7], 0  ;;  %s2835_s17 = smov [#allocation8]   ;;  %s2836_s19 = smov [#allocation5]  }
   0x4   :  { %s45_s18 = sshll.u32 %s2835_s17, 4  ;;  %s27_s20 = sshll.u32 %s2836_s19, 4  ;;  %s46_s18 = int_to_ptr.vmem [resolvable:$true] %s45_s18  ;;  %s2910_s20 = int_to_ptr.vmem [resolvable:$true] %s27_s20 }
   0x5   :  { %s2717_s23 = scalar_lea.hbm %s3462_s5, 256 }
   0x6   :  { %p2718_p0 = scmp.ne.s32.totalorder %s3462_s5, %s2717_s23  ;;  %p2721_p1 = scmp.lt.u32.totalorder %s2717_s23, %s3462_s5 }
   0x8   :  { %p2723_p2 = pnand %p2721_p1, %p2718_p0 }
   0xa   :  { %2726 = shalt.err (!%p2723_p2)
}
   0xb   :  { %s2727_s28 = scalar_lea.vmem %s46_s18, 256  ;;  %p2732_p4 = scmp.lt.s32.totalorder %s46_s18, %s46_s18 }
   0xc   :  { %p2728_p3 = scmp.ne.s32.totalorder %s46_s18, %s2727_s28  ;;  %p2733_p5 = scmp.lt.s32.totalorder %s2727_s28, %s2727_s28 }
   0xe   :  { %p2734_p6 = por %p2733_p5, %p2732_p4 }
  0x10   :  { %p2735_p7 = pnand %p2734_p6, %p2728_p3 }
  0x12   :  { %2738 = shalt.err (!%p2735_p7)
}
  0x13   :  { %s2837_s29 = smov 64   ;;  %s2838_s30 = smov 4  }
  0x14   :  { %51 = dma.hbm_to_vmem [thread:$0]  %s3462_s5, 256, %s46_s18, [#allocation9], %s2837_s29, %s2837_s29, %s2838_s30  }
  0x15   :  { %s2739_s16 = scalar_lea.hbm %s3458_s1, 128 }
  0x16   :  { %p2740_p8 = scmp.ne.s32.totalorder %s3458_s1, %s2739_s16  ;;  %p2743_p9 = scmp.lt.u32.totalorder %s2739_s16, %s3458_s1 }
  0x18   :  { %p2745_p10 = pnand %p2743_p9, %p2740_p8 }
  0x1a   :  { %2748 = shalt.err (!%p2745_p10)
}
  0x1b   :  { %s2749_s23 = scalar_lea.vmem %s2910_s20, 128  ;;  %p2754_p12 = scmp.lt.s32.totalorder %s2910_s20, %s2910_s20 }
  0x1c   :  { %p2750_p11 = scmp.ne.s32.totalorder %s2910_s20, %s2749_s23  ;;  %p2755_p13 = scmp.lt.s32.totalorder %s2749_s23, %s2749_s23 }
  0x1e   :  { %p2756_p0 = por %p2755_p13, %p2754_p12 }
  0x20   :  { %p2757_p1 = pnand %p2756_p0, %p2750_p11 }
  0x22   :  { %2760 = shalt.err (!%p2757_p1)
}
  0x23   :  { %33 = dma.hbm_to_vmem [thread:$0]  %s3458_s1, 128, %s2910_s20, [#allocation6], %s2837_s29, %s2837_s29, %s2838_s30  }
  0x24   :  { %s2839_s24 = smov [#allocation10]   ;;  %s2840_s26 = smov [#allocation11]  }
  0x25   :  { %s60_s25 = sshll.u32 %s2839_s24, 4  ;;  %s70_s27 = sshll.u32 %s2840_s26, 4  ;;  %s61_s25 = int_to_ptr.vmem [resolvable:$true] %s60_s25  ;;  %s71_s27 = int_to_ptr.vmem [resolvable:$true] %s70_s27 }
  0x26   :  { %s2761_s13 = scalar_lea.hbm %s3464_s7, 16 }
  0x27   :  { %p2762_p2 = scmp.ne.s32.totalorder %s3464_s7, %s2761_s13  ;;  %p2765_p3 = scmp.lt.u32.totalorder %s2761_s13, %s3464_s7 }
  0x29   :  { %p2767_p4 = pnand %p2765_p3, %p2762_p2 }
  0x2b   :  { %2770 = shalt.err (!%p2767_p4)
}
  0x2c   :  { %s2771_s1 = scalar_lea.vmem %s61_s25, 16  ;;  %s2775_s20 = scalar_lea.vmem %s61_s25, 32 }
  0x2d   :  { %p2772_p5 = scmp.ne.s32.totalorder %s61_s25, %s2771_s1  ;;  %p2776_p6 = scmp.lt.s32.totalorder %s61_s25, %s61_s25 }
  0x2e   :  { %p2777_p7 = scmp.lt.s32.totalorder %s2775_s20, %s2771_s1 }
  0x30   :  { %p2778_p8 = por %p2777_p7, %p2776_p6 }
  0x32   :  { %p2779_p9 = pnand %p2778_p8, %p2772_p5 }
  0x34   :  { %2782 = shalt.err (!%p2779_p9)
}
  0x35   :  { %63 = dma.hbm_to_vmem [thread:$0]  %s3464_s7, 16, %s61_s25, [#allocation9]  }
  0x36   :  { %s2783_s23 = scalar_lea.hbm %s3465_s8, 16 }
  0x37   :  { %p2784_p10 = scmp.ne.s32.totalorder %s3465_s8, %s2783_s23  ;;  %p2787_p11 = scmp.lt.u32.totalorder %s2783_s23, %s3465_s8 }
  0x39   :  { %p2789_p12 = pnand %p2787_p11, %p2784_p10 }
  0x3b   :  { %2792 = shalt.err (!%p2789_p12)
}
  0x3c   :  { %s2793_s28 = scalar_lea.vmem %s71_s27, 16  ;;  %s2797_s12 = scalar_lea.vmem %s71_s27, 32 }
  0x3d   :  { %p2794_p13 = scmp.ne.s32.totalorder %s71_s27, %s2793_s28  ;;  %p2798_p0 = scmp.lt.s32.totalorder %s71_s27, %s71_s27 }
  0x3e   :  { %p2799_p1 = scmp.lt.s32.totalorder %s2797_s12, %s2793_s28 }
  0x40   :  { %p2800_p2 = por %p2799_p1, %p2798_p0 }
  0x42   :  { %p2801_p3 = pnand %p2800_p2, %p2794_p13 }
  0x44   :  { %2804 = shalt.err (!%p2801_p3)
}
  0x45   :  { %73 = dma.hbm_to_vmem [thread:$0]  %s3465_s8, 16, %s71_s27, [#allocation12]  }
  0x46   :  { %2827 = dma.done.wait [#allocation6], 128  }
  0x47   :  { %2828 = vsyncadd [#allocation6], 4294967168 }
  0x48   :  { %2829 = dma.done.wait [#allocation9], 272  }
  0x49   :  { %2830 = vsyncadd [#allocation9], 4294967024 }
  0x4a   :  { %2831 = dma.done.wait [#allocation12], 16  }
  0x4b   :  { %2832 = vsyncadd [#allocation12], 4294967280  ;;  %vm95_vm0 = vcmask 254976   ;;  %v2841_v0 = vmov 0.0   ;;  %vm2842_vm1 = vmmov 0   ;;  %v2612_v1 = vld [vmem:[#allocation5] sm:$0xff]   ;;  %v182_v12 = vlaneseq }
  0x4c   :  { %2447 = vmatprep.subr.bf16.mxu0 %v2841_v0  ;;  %2453 = vmatprep.subr.bf16.mxu1 %v2841_v0  ;;  %96 = vst.msk [vmem:[#allocation2] sm:$0x3] %vm95_vm0, %v2841_v0  ;;  %97 = vst.msk [vmem:[#allocation2 + $0x2] sm:$0x3] %vm95_vm0, %v2841_v0  ;;  %v2982_v2 = vld [vmem:[%s3459_s2] sm:$0xff]   ;;  %v112_v4 = vld [vmem:[%s3457_s0 + $0x8] sm:$0xff] }
  0x4d   :  { %2449 = vmatprep.mubr.msk.bf16.mxu0 %vm2842_vm1, %v2841_v0  ;;  %2457 = vmatprep.mubr.msk.bf16.mxu1 %vm2842_vm1, %v2841_v0  ;;  %v111_v3 = vld [vmem:[%s3457_s0] sm:$0xff]  ;;  %vm132_vm2 = vcmask 130048   ;;  %v2994_v6 = vld [vmem:[%s3459_s2 + $0x8] sm:$0xff]   ;;  %vm325_vm3 = vcmask 261120   ;;  %v2843_v10 = vmov 1966171168  }
  0x4e   :  { %2448 = vmatpush3.bf16.msra.mxu0 %v2612_v1  ;;  %2454 = vmatpush3.bf16.msra.mxu1 %v2982_v2  ;;  %v2390_v5 = vpack.c.bf16 %v112_v4, %v111_v3  ;;  %v2340_v8 = vld [vmem:[%s3461_s4] ss:$0 sm:$0xff]  ;;  %v180_v11 = vunpack.c.l.s4 %v2843_v10  ;;  %v3021_v14 = vshrl.u32 %v182_v12, 7  ;;  %vm235_vm4 = vcmask 778240   ;;  %s2845_s4 = smov 96  }
  0x4f   :  { %2461 = vmatprep.subr.bf16.mxu0 %v2841_v0  ;;  %2455 = vmatprep.subr.bf16.mxu1 %v2841_v0  ;;  %v2341_v15 = vld [vmem:[%s3460_s3] ss:$0 sm:$0xff]  ;;  %s2844_s3 = smov 32   ;;  %vm422_vm5 = vcmask 253952   ;;  %vm1281_vm6 = vcmask 779264   ;;  %vm2259_vm7 = vcmask 1041409  }
  0x50   :  { %376 = vrot.lane.b32.xlu0 %v2340_v8, %s2837_s29  ;;  %v181_v13 = vunpack.c.0.s8 %v180_v11  ;;  %vm2261_vm8 = vcmask 1042434   ;;  %vm2263_vm9 = vcmask 1043459   ;;  %vm2265_vm10 = vcmask 1044484  }
  0x51   :  { %2450 = vmatmul.mubr.msk.bf16.vlgmr.msra.gmra.mrb[0].mxu0 %vm132_vm2, %v2390_v5  ;;  %vm2267_vm11 = vcmask 1045509   ;;  %vm2269_vm12 = vcmask 1046534   ;;  %vm2271_vm13 = vcmask 1047559   ;;  %vm2274_vm14 = vcmask 195584  }
  0x52   :  { %2462 = vmatpush3.bf16.msra.mxu0 %v2982_v2  ;;  %2465 = vmatprep.mubr.msk.bf16.mxu0 %vm2842_vm1, %v2841_v0  ;;  %v3027_v16 = vsub.s32 %v181_v13, %v3021_v14  ;;  %vm2319_vm15 = vcmask 188416  }
  0x53   :  { %v2996_v7 = vld [vmem:[#allocation2] sm:$0x3]  ;;  %2456 = vmatpush3.bf16.msra.mxu1 %v2994_v6  ;;  %2463 = vmatprep.subr.bf16.mxu0 %v2841_v0 }
  0x54   :  { %v312_v9 = vpack.c.bf16 %v2996_v7, %v2996_v7  ;;  %2469 = vmatprep.subr.bf16.mxu1 %v2841_v0 }
  0x56   :  { %2458 = vmatmul.mubr.msk.bf16.vlgmr.msra.gmra.mrb[0].mxu1 %vm325_vm3, %v312_v9  ;;  %2464 = vmatpush3.bf16.msra.mxu0 %v2994_v6 }
  0x57   :  { %2470 = vmatpush3.bf16.msra.mxu1 %v2982_v2  ;;  %2473 = vmatprep.mubr.msk.bf16.mxu1 %vm2842_vm1, %v2841_v0 }
  0x58   :  { %2471 = vmatprep.subr.bf16.mxu1 %v2841_v0  ;;  %2477 = vmatprep.subr.bf16.mxu0 %v2841_v0 }
  0x5b   :  { %2472 = vmatpush3.bf16.msra.mxu1 %v2994_v6 }
  0x5c   :  { %2485 = vmatprep.subr.bf16.mxu1 %v2841_v0 }
  0xc2   :  { %v3030_v24 = vpop.permute.xlu0 %376 }
 0x124   :  { %v170_v17 = vpop.f32.mrb[0].mxu0 }
 0x125   :  { %v171_v18 = vadd.f32 %v2341_v15, %v170_v17  ;;  %v2451_v19 = vpop.f32.mrb[1].mxu0 }
 0x126   :  { %v173_v20 = vpop.f32.mrb[2].mxu0 }
 0x127   :  { %v178_v21 = vcombine.high %v171_v18, %v171_v18  ;;  %v185_v22 = vrot.slane %v171_v18, %v3027_v16  ;;  %v174_v23 = vadd.f32 %v2341_v15, %v173_v20  ;;  %v2452_v25 = vpop.f32.mrb[3].mxu0 }
 0x129   :  { %v192_v26 = vrot.slane %v178_v21, %v3027_v16  ;;  %v193_v27 = vcombine.high %v185_v22, %v185_v22  ;;  %v201_v28 = vrot.slane %v185_v22, %v3027_v16  ;;  %v245_v29 = vcombine.high %v174_v23, %v174_v23  ;;  %v363_v30 = vpop.f32.mrb[0].mxu1 }
 0x12a   :  { %v252_v31 = vrot.slane %v174_v23, %v3027_v16  ;;  %v2459_v32 = vpop.f32.mrb[1].mxu1  ;;  %v379_v33 = vadd.f32 %v3030_v24, %v363_v30 }
 0x12b   :  { %v194_v34 = vcombine.high %v192_v26, %v192_v26  ;;  %v208_v35 = vrot.slane %v192_v26, %v3027_v16  ;;  %v215_v36 = vrot.slane %v193_v27, %v3027_v16  ;;  %v223_v37 = vcombine.high %v201_v28, %v201_v28  ;;  %236 = vst.msk [vmem:[#allocation3] sm:$0x1] %vm235_vm4, %v201_v28  ;;  %v366_v38 = vpop.f32.mrb[2].mxu1 }
 0x12c   :  { %v259_v39 = vrot.slane %v245_v29, %v3027_v16  ;;  %v260_v40 = vcombine.high %v252_v31, %v252_v31  ;;  %v268_v41 = vrot.slane %v252_v31, %v3027_v16  ;;  %381 = vrot.lane.b32.xlu0 %v379_v33, %s2837_s29  ;;  %v2460_v42 = vpop.f32.mrb[3].mxu1 }
 0x12d   :  { %v222_v43 = vrot.slane %v194_v34, %v3027_v16  ;;  %v224_v44 = vcombine.high %v208_v35, %v208_v35  ;;  %v225_v45 = vcombine.high %v215_v36, %v215_v36  ;;  %237 = vst.msk [vmem:[#allocation3 + $0x2] sm:$0x1] %vm235_vm4, %v215_v36  ;;  %238 = vst.msk [vmem:[#allocation3 + $0x4] sm:$0x1] %vm235_vm4, %v223_v37 }
 0x12e   :  { %240 = vst.msk [vmem:[#allocation3 + $0x8] sm:$0x1] %vm235_vm4, %v208_v35  ;;  %v261_v46 = vcombine.high %v259_v39, %v259_v39  ;;  %v275_v47 = vrot.slane %v259_v39, %v3027_v16  ;;  %v282_v48 = vrot.slane %v260_v40, %v3027_v16  ;;  %v290_v49 = vcombine.high %v268_v41, %v268_v41 }
 0x12f   :  { %302 = vst.msk [vmem:[#allocation3 + $0x1] sm:$0x1] %vm235_vm4, %v268_v41  ;;  %v226_v50 = vcombine.high %v222_v43, %v222_v43  ;;  %239 = vst.msk [vmem:[#allocation3 + $0x6] sm:$0x1] %vm235_vm4, %v225_v45 }
 0x130   :  { %241 = vst.msk [vmem:[#allocation3 + $0xa] sm:$0x1] %vm235_vm4, %v222_v43  ;;  %242 = vst.msk [vmem:[#allocation3 + $0xc] sm:$0x1] %vm235_vm4, %v224_v44  ;;  %v289_v51 = vrot.slane %v261_v46, %v3027_v16  ;;  %v291_v52 = vcombine.high %v275_v47, %v275_v47  ;;  %v292_v53 = vcombine.high %v282_v48, %v282_v48  ;;  %398 = vrot.lane.b32.xlu0 %v2996_v7, %s2844_s3 }
 0x131   :  { %303 = vst.msk [vmem:[#allocation3 + $0x3] sm:$0x1] %vm235_vm4, %v282_v48  ;;  %304 = vst.msk [vmem:[#allocation3 + $0x5] sm:$0x1] %vm235_vm4, %v290_v49 }
 0x132   :  { %306 = vst.msk [vmem:[#allocation3 + $0x9] sm:$0x1] %vm235_vm4, %v275_v47  ;;  %243 = vst.msk [vmem:[#allocation3 + $0xe] sm:$0x1] %vm235_vm4, %v226_v50  ;;  %v293_v54 = vcombine.high %v289_v51, %v289_v51 }
 0x133   :  { %305 = vst.msk [vmem:[#allocation3 + $0x7] sm:$0x1] %vm235_vm4, %v292_v53  ;;  %307 = vst.msk [vmem:[#allocation3 + $0xb] sm:$0x1] %vm235_vm4, %v289_v51 }
 0x134   :  { %308 = vst.msk [vmem:[#allocation3 + $0xd] sm:$0x1] %vm235_vm4, %v291_v52  ;;  %309 = vst.msk [vmem:[#allocation3 + $0xf] sm:$0x1] %vm235_vm4, %v293_v54 }
 0x136   :  { %v311_v55 = vld [vmem:[#allocation3] sm:$0x3] }
 0x137   :  { %v369_v56 = vadd.f32 %v363_v30, %v311_v55 }
 0x138   :  { %v425_v20 = vld [vmem:[#allocation3 + $0x2] sm:$0x3]  ;;  %v520_v44 = vld [vmem:[#allocation3 + $0x4] sm:$0x3] }
 0x139   :  { %v2348_v57 = vmul.f32 -1.442695, %v369_v56 }
 0x13b   :  { %2621 = vpow2.f32 %v2348_v57 }
 0x145   :  { %v2622_v58 = vpop.eup %2621 }
 0x146   :  { %v373_v59 = vadd.f32 1.0, %v2622_v58 }
 0x148   :  { %2623 = vrcp.f32 %v373_v59 }
 0x152   :  { %v2624_v60 = vpop.eup %2623 }
 0x153   :  { %v391_v5 = vsub.f32 1.0, %v2624_v60 }
 0x19e   :  { %v382_v61 = vpop.permute.xlu0 %381 }
 0x19f   :  { %v384_v62 = vmul.f32 %v2624_v60, %v382_v61 }
 0x1a1   :  { %386 = vrot.lane.b32.xlu1 %v384_v62, %s2837_s29 }
 0x1a2   :  { %v399_v4 = vpop.permute.xlu0 %398 }
 0x1a3   :  { %v401_v8 = vmul.f32 %v2624_v60, %v399_v4 }
 0x213   :  { %v387_v63 = vpop.permute.xlu1 %386 }
 0x214   :  { %v389_v1 = vadd.f32 %v387_v63, %v311_v55 }
 0x216   :  { %2625 = vtanh.f32 %v389_v1 }
 0x220   :  { %v2626_v3 = vpop.eup %2625 }
 0x221   :  { %393 = vrot.lane.b32.xlu1 %v2626_v3, %s2845_s4 }
 0x293   :  { %v394_v7 = vpop.permute.xlu1 %393 }
 0x294   :  { %v396_v9 = vmul.f32 %v394_v7, %v391_v5  ;;  %v615_v5 = vld [vmem:[#allocation3 + $0x6] sm:$0x3] }
 0x296   :  { %v402_v10 = vadd.f32 %v401_v8, %v396_v9 }
 0x298   :  { %v3065_v11 = vpack.c.bf16 %v402_v10, %v402_v10 }
 0x29a   :  { %426 = vrot.lane.b32.xlu1 %v3065_v11, %s2845_s4 }
 0x30c   :  { %v427_v12 = vpop.permute.xlu1 %426 }
 0x30d   :  { %2466 = vmatmul.mubr.msk.bf16.vlgmr.msra.gmra.mrb[4].mxu0 %vm325_vm3, %v427_v12 }
 0x30e   :  { %2478 = vmatpush3.bf16.msra.mxu0 %v2982_v2  ;;  %2481 = vmatprep.mubr.msk.bf16.mxu0 %vm2842_vm1, %v2841_v0 }
 0x30f   :  { %2479 = vmatprep.subr.bf16.mxu0 %v2841_v0 }
 0x312   :  { %2480 = vmatpush3.bf16.msra.mxu0 %v2994_v6 }
 0x313   :  { %2493 = vmatprep.subr.bf16.mxu0 %v2841_v0 }
 0x3e0   :  { %v465_v13 = vpop.f32.mrb[4].mxu0 }
 0x3e1   :  { %v2467_v15 = vpop.f32.mrb[5].mxu0  ;;  %v478_v17 = vadd.f32 %v465_v13, %v3030_v24  ;;  %v471_v21 = vadd.f32 %v465_v13, %v425_v20 }
 0x3e2   :  { %v468_v18 = vpop.f32.mrb[6].mxu0 }
 0x3e3   :  { %480 = vrot.lane.b32.xlu0 %v478_v17, %s2837_s29  ;;  %v2468_v19 = vpop.f32.mrb[7].mxu0  ;;  %v2350_v22 = vmul.f32 -1.442695, %v471_v21 }
 0x3e5   :  { %2627 = vpow2.f32 %v2350_v22 }
 0x3ef   :  { %v2628_v23 = vpop.eup %2627 }
 0x3f0   :  { %v475_v25 = vadd.f32 1.0, %v2628_v23 }
 0x3f2   :  { %2629 = vrcp.f32 %v475_v25 }
 0x3fc   :  { %v2630_v26 = vpop.eup %2629 }
 0x3fd   :  { %v490_v32 = vsub.f32 1.0, %v2630_v26  ;;  %v496_v34 = vmul.f32 %v2630_v26, %v402_v10 }
 0x455   :  { %v481_v27 = vpop.permute.xlu0 %480 }
 0x456   :  { %v483_v28 = vmul.f32 %v2630_v26, %v481_v27 }
 0x458   :  { %485 = vrot.lane.b32.xlu1 %v483_v28, %s2837_s29 }
 0x4ca   :  { %v486_v29 = vpop.permute.xlu1 %485 }
 0x4cb   :  { %v488_v30 = vadd.f32 %v486_v29, %v425_v20 }
 0x4cd   :  { %2631 = vtanh.f32 %v488_v30 }
 0x4d7   :  { %v2632_v31 = vpop.eup %2631 }
 0x4d8   :  { %492 = vrot.lane.b32.xlu0 %v2632_v31, %s2845_s4 }
 0x54a   :  { %v493_v33 = vpop.permute.xlu0 %492 }
 0x54b   :  { %v495_v35 = vmul.f32 %v493_v33, %v490_v32  ;;  %v710_v33 = vld [vmem:[#allocation3 + $0x8] sm:$0x3] }
 0x54d   :  { %v497_v36 = vadd.f32 %v496_v34, %v495_v35 }
 0x54f   :  { %v3080_v37 = vpack.c.bf16 %v497_v36, %v497_v36 }
 0x551   :  { %521 = vrot.lane.b32.xlu1 %v3080_v37, %s2845_s4 }
 0x5c3   :  { %v522_v38 = vpop.permute.xlu1 %521 }
 0x5c4   :  { %2474 = vmatmul.mubr.msk.bf16.vlgmr.msra.gmra.mrb[4].mxu1 %vm325_vm3, %v522_v38 }
 0x5c5   :  { %2486 = vmatpush3.bf16.msra.mxu1 %v2982_v2  ;;  %2489 = vmatprep.mubr.msk.bf16.mxu1 %vm2842_vm1, %v2841_v0 }
 0x5c6   :  { %2487 = vmatprep.subr.bf16.mxu1 %v2841_v0 }
 0x5c9   :  { %2488 = vmatpush3.bf16.msra.mxu1 %v2994_v6 }
 0x5ca   :  { %2501 = vmatprep.subr.bf16.mxu1 %v2841_v0 }
 0x697   :  { %v560_v39 = vpop.f32.mrb[4].mxu1 }
 0x698   :  { %v2475_v40 = vpop.f32.mrb[5].mxu1  ;;  %v573_v41 = vadd.f32 %v560_v39, %v3030_v24  ;;  %v566_v45 = vadd.f32 %v560_v39, %v520_v44 }
 0x699   :  { %v563_v42 = vpop.f32.mrb[6].mxu1 }
 0x69a   :  { %575 = vrot.lane.b32.xlu0 %v573_v41, %s2837_s29  ;;  %v2476_v43 = vpop.f32.mrb[7].mxu1  ;;  %v2352_v46 = vmul.f32 -1.442695, %v566_v45 }
 0x69c   :  { %2633 = vpow2.f32 %v2352_v46 }
 0x6a6   :  { %v2634_v47 = vpop.eup %2633 }
 0x6a7   :  { %v570_v48 = vadd.f32 1.0, %v2634_v47 }
 0x6a9   :  { %2635 = vrcp.f32 %v570_v48 }
 0x6b3   :  { %v2636_v49 = vpop.eup %2635 }
 0x6b4   :  { %v585_v55 = vsub.f32 1.0, %v2636_v49  ;;  %v591_v57 = vmul.f32 %v2636_v49, %v497_v36 }
 0x70c   :  { %v576_v50 = vpop.permute.xlu0 %575 }
 0x70d   :  { %v578_v51 = vmul.f32 %v2636_v49, %v576_v50 }
 0x70f   :  { %580 = vrot.lane.b32.xlu1 %v578_v51, %s2837_s29 }
 0x781   :  { %v581_v52 = vpop.permute.xlu1 %580 }
 0x782   :  { %v583_v53 = vadd.f32 %v581_v52, %v520_v44 }
 0x784   :  { %2637 = vtanh.f32 %v583_v53 }
 0x78e   :  { %v2638_v54 = vpop.eup %2637 }
 0x78f   :  { %587 = vrot.lane.b32.xlu0 %v2638_v54, %s2845_s4 }
 0x801   :  { %v588_v56 = vpop.permute.xlu0 %587 }
 0x802   :  { %v590_v58 = vmul.f32 %v588_v56, %v585_v55 }
 0x804   :  { %v592_v59 = vadd.f32 %v591_v57, %v590_v58  ;;  %v805_v57 = vld [vmem:[#allocation3 + $0xa] sm:$0x3] }
 0x806   :  { %v3095_v60 = vpack.c.bf16 %v592_v59, %v592_v59 }
 0x808   :  { %616 = vrot.lane.b32.xlu1 %v3095_v60, %s2845_s4 }
 0x87a   :  { %v617_v61 = vpop.permute.xlu1 %616 }
 0x87b   :  { %2482 = vmatmul.mubr.msk.bf16.vlgmr.msra.gmra.mrb[8].mxu0 %vm325_vm3, %v617_v61 }
 0x87c   :  { %2494 = vmatpush3.bf16.msra.mxu0 %v2982_v2  ;;  %2497 = vmatprep.mubr.msk.bf16.mxu0 %vm2842_vm1, %v2841_v0 }
 0x87d   :  { %2495 = vmatprep.subr.bf16.mxu0 %v2841_v0 }
 0x880   :  { %2496 = vmatpush3.bf16.msra.mxu0 %v2994_v6 }
 0x881   :  { %2509 = vmatprep.subr.bf16.mxu0 %v2841_v0 }
 0x94e   :  { %v655_v62 = vpop.f32.mrb[8].mxu0 }
 0x94f   :  { %v2483_v63 = vpop.f32.mrb[9].mxu0  ;;  %v668_v1 = vadd.f32 %v655_v62, %v3030_v24  ;;  %v661_v7 = vadd.f32 %v655_v62, %v615_v5 }
 0x950   :  { %v658_v3 = vpop.f32.mrb[10].mxu0 }
 0x951   :  { %670 = vrot.lane.b32.xlu0 %v668_v1, %s2837_s29  ;;  %v2484_v4 = vpop.f32.mrb[11].mxu0  ;;  %v2354_v8 = vmul.f32 -1.442695, %v661_v7 }
 0x953   :  { %2639 = vpow2.f32 %v2354_v8 }
 0x95d   :  { %v2640_v9 = vpop.eup %2639 }
 0x95e   :  { %v665_v10 = vadd.f32 1.0, %v2640_v9 }
 0x960   :  { %2641 = vrcp.f32 %v665_v10 }
 0x96a   :  { %v2642_v12 = vpop.eup %2641 }
 0x96b   :  { %v680_v20 = vsub.f32 1.0, %v2642_v12  ;;  %v686_v22 = vmul.f32 %v2642_v12, %v592_v59 }
 0x9c3   :  { %v671_v13 = vpop.permute.xlu0 %670 }
 0x9c4   :  { %v673_v15 = vmul.f32 %v2642_v12, %v671_v13 }
 0x9c6   :  { %675 = vrot.lane.b32.xlu1 %v673_v15, %s2837_s29 }
 0xa38   :  { %v676_v17 = vpop.permute.xlu1 %675 }
 0xa39   :  { %v678_v18 = vadd.f32 %v676_v17, %v615_v5 }
 0xa3b   :  { %2643 = vtanh.f32 %v678_v18 }
 0xa45   :  { %v2644_v19 = vpop.eup %2643 }
 0xa46   :  { %682 = vrot.lane.b32.xlu0 %v2644_v19, %s2845_s4 }
 0xab8   :  { %v683_v21 = vpop.permute.xlu0 %682 }
 0xab9   :  { %v685_v23 = vmul.f32 %v683_v21, %v680_v20  ;;  %v900_v21 = vld [vmem:[#allocation3 + $0xc] sm:$0x3] }
 0xabb   :  { %v687_v25 = vadd.f32 %v686_v22, %v685_v23 }
 0xabd   :  { %v3110_v26 = vpack.c.bf16 %v687_v25, %v687_v25 }
 0xabf   :  { %711 = vrot.lane.b32.xlu1 %v3110_v26, %s2845_s4 }
 0xb31   :  { %v712_v27 = vpop.permute.xlu1 %711 }
 0xb32   :  { %2490 = vmatmul.mubr.msk.bf16.vlgmr.msra.gmra.mrb[8].mxu1 %vm325_vm3, %v712_v27 }
 0xb33   :  { %2502 = vmatpush3.bf16.msra.mxu1 %v2982_v2  ;;  %2505 = vmatprep.mubr.msk.bf16.mxu1 %vm2842_vm1, %v2841_v0 }
 0xb34   :  { %2503 = vmatprep.subr.bf16.mxu1 %v2841_v0 }
 0xb37   :  { %2504 = vmatpush3.bf16.msra.mxu1 %v2994_v6 }
 0xb38   :  { %2517 = vmatprep.subr.bf16.mxu1 %v2841_v0 }
 0xc05   :  { %v750_v28 = vpop.f32.mrb[8].mxu1 }
 0xc06   :  { %v2491_v29 = vpop.f32.mrb[9].mxu1  ;;  %v763_v30 = vadd.f32 %v750_v28, %v3030_v24  ;;  %v756_v34 = vadd.f32 %v750_v28, %v710_v33 }
 0xc07   :  { %v753_v31 = vpop.f32.mrb[10].mxu1 }
 0xc08   :  { %765 = vrot.lane.b32.xlu0 %v763_v30, %s2837_s29  ;;  %v2492_v32 = vpop.f32.mrb[11].mxu1  ;;  %v2356_v35 = vmul.f32 -1.442695, %v756_v34 }
 0xc0a   :  { %2645 = vpow2.f32 %v2356_v35 }
 0xc14   :  { %v2646_v36 = vpop.eup %2645 }
 0xc15   :  { %v760_v38 = vadd.f32 1.0, %v2646_v36 }
 0xc17   :  { %2647 = vrcp.f32 %v760_v38 }
 0xc21   :  { %v2648_v39 = vpop.eup %2647 }
 0xc22   :  { %v775_v45 = vsub.f32 1.0, %v2648_v39  ;;  %v781_v47 = vmul.f32 %v2648_v39, %v687_v25 }
 0xc7a   :  { %v766_v40 = vpop.permute.xlu0 %765 }
 0xc7b   :  { %v768_v41 = vmul.f32 %v2648_v39, %v766_v40 }
 0xc7d   :  { %770 = vrot.lane.b32.xlu1 %v768_v41, %s2837_s29 }
 0xcef   :  { %v771_v42 = vpop.permute.xlu1 %770 }
 0xcf0   :  { %v773_v43 = vadd.f32 %v771_v42, %v710_v33 }
 0xcf2   :  { %2649 = vtanh.f32 %v773_v43 }
 0xcfc   :  { %v2650_v44 = vpop.eup %2649 }
 0xcfd   :  { %777 = vrot.lane.b32.xlu0 %v2650_v44, %s2845_s4 }
 0xd6f   :  { %v778_v46 = vpop.permute.xlu0 %777 }
 0xd70   :  { %v780_v48 = vmul.f32 %v778_v46, %v775_v45 }
 0xd72   :  { %v782_v49 = vadd.f32 %v781_v47, %v780_v48  ;;  %v995_v47 = vld [vmem:[#allocation3 + $0xe] sm:$0x3] }
 0xd74   :  { %v3125_v50 = vpack.c.bf16 %v782_v49, %v782_v49 }
 0xd76   :  { %806 = vrot.lane.b32.xlu1 %v3125_v50, %s2845_s4 }
 0xde8   :  { %v807_v51 = vpop.permute.xlu1 %806 }
 0xde9   :  { %2498 = vmatmul.mubr.msk.bf16.vlgmr.msra.gmra.mrb[12].mxu0 %vm325_vm3, %v807_v51 }
 0xdea   :  { %2510 = vmatpush3.bf16.msra.mxu0 %v2982_v2  ;;  %2513 = vmatprep.mubr.msk.bf16.mxu0 %vm2842_vm1, %v2841_v0 }
 0xdeb   :  { %2511 = vmatprep.subr.bf16.mxu0 %v2841_v0 }
 0xdee   :  { %2512 = vmatpush3.bf16.msra.mxu0 %v2994_v6 }
 0xdef   :  { %2525 = vmatprep.subr.bf16.mxu0 %v2841_v0 }
 0xebc   :  { %v845_v52 = vpop.f32.mrb[12].mxu0 }
 0xebd   :  { %v2499_v53 = vpop.f32.mrb[13].mxu0  ;;  %v858_v54 = vadd.f32 %v845_v52, %v3030_v24  ;;  %v851_v58 = vadd.f32 %v845_v52, %v805_v57 }
 0xebe   :  { %v848_v55 = vpop.f32.mrb[14].mxu0 }
 0xebf   :  { %860 = vrot.lane.b32.xlu0 %v858_v54, %s2837_s29  ;;  %v2500_v56 = vpop.f32.mrb[15].mxu0  ;;  %v2358_v2 = vmul.f32 -1.442695, %v851_v58 }
 0xec0   :  { %v411_v56 = vrot.slane %v3065_v11, %v3027_v16 }
 0xec1   :  { %2651 = vpow2.f32 %v2358_v2  ;;  %v791_v2 = vrot.slane %v3125_v50, %v3027_v16 }
 0xecb   :  { %v2652_v59 = vpop.eup %2651 }
 0xecc   :  { %v855_v61 = vadd.f32 1.0, %v2652_v59  ;;  %v798_v59 = vrot.slane %v791_v2, %v3027_v16 }
 0xece   :  { %2653 = vrcp.f32 %v855_v61 }
 0xed8   :  { %v2654_v62 = vpop.eup %2653 }
 0xed9   :  { %v870_v5 = vsub.f32 1.0, %v2654_v62  ;;  %v876_v8 = vmul.f32 %v2654_v62, %v782_v49 }
 0xf31   :  { %v861_v63 = vpop.permute.xlu0 %860 }
 0xf32   :  { %v863_v6 = vmul.f32 %v2654_v62, %v861_v63 }
 0xf34   :  { %865 = vrot.lane.b32.xlu1 %v863_v6, %s2837_s29 }
 0xfa6   :  { %v866_v1 = vpop.permute.xlu1 %865 }
 0xfa7   :  { %v868_v3 = vadd.f32 %v866_v1, %v805_v57  ;;  %v601_v57 = vrot.slane %v3095_v60, %v3027_v16  ;;  %v506_v1 = vrot.slane %v3080_v37, %v3027_v16 }
 0xfa9   :  { %2655 = vtanh.f32 %v868_v3  ;;  %v608_v58 = vrot.slane %v601_v57, %v3027_v16 }
 0xfb3   :  { %v2656_v4 = vpop.eup %2655 }
 0xfb4   :  { %872 = vrot.lane.b32.xlu0 %v2656_v4, %s2845_s4  ;;  %v3185_v4 = vld [vmem:[%s3463_s6] sm:$0xff]  }
0x1026   :  { %v873_v7 = vpop.permute.xlu0 %872 }
0x1027   :  { %v875_v9 = vmul.f32 %v873_v7, %v870_v5  ;;  %v3192_v5 = vld [vmem:[%s3463_s6 + $0x8] sm:$0xff]   ;;  %v3194_v7 = vld [vmem:[#allocation2 + $0x2] sm:$0x3] }
0x1029   :  { %v877_v10 = vadd.f32 %v876_v8, %v875_v9  ;;  %v513_v8 = vrot.slane %v506_v1, %v3027_v16  ;;  %v696_v9 = vrot.slane %v3110_v26, %v3027_v16 }
0x102b   :  { %v3140_v12 = vpack.c.bf16 %v877_v10, %v877_v10 }
0x102d   :  { %901 = vrot.lane.b32.xlu1 %v3140_v12, %s2845_s4 }
0x109f   :  { %v902_v13 = vpop.permute.xlu1 %901 }
0x10a0   :  { %2506 = vmatmul.mubr.msk.bf16.vlgmr.msra.gmra.mrb[12].mxu1 %vm325_vm3, %v902_v13  ;;  %v703_v13 = vrot.slane %v696_v9, %v3027_v16 }
0x10a1   :  { %2521 = vmatprep.mubr.msk.bf16.mxu1 %vm2842_vm1, %v2841_v0 }
0x1173   :  { %v940_v15 = vpop.f32.mrb[12].mxu1 }
0x1174   :  { %v2507_v17 = vpop.f32.mrb[13].mxu1  ;;  %v953_v18 = vadd.f32 %v940_v15, %v3030_v24  ;;  %v946_v22 = vadd.f32 %v940_v15, %v900_v21  ;;  %v886_v15 = vrot.slane %v3140_v12, %v3027_v16  ;;  %v2617_v12 = vld [vmem:[#allocation8] sm:$0xff]  }
0x1175   :  { %v943_v19 = vpop.f32.mrb[14].mxu1  ;;  %2518 = vmatpush3.bf16.msra.mxu1 %v2617_v12 }
0x1176   :  { %955 = vrot.lane.b32.xlu0 %v953_v18, %s2837_s29  ;;  %v2508_v20 = vpop.f32.mrb[15].mxu1  ;;  %v2360_v23 = vmul.f32 -1.442695, %v946_v22  ;;  %v893_v26 = vrot.slane %v886_v15, %v3027_v16  ;;  %v2618_v19 = vld [vmem:[#allocation8 + $0x8] sm:$0xff]   ;;  %2519 = vmatprep.subr.bf16.mxu1 %v2841_v0 }
0x1178   :  { %2657 = vpow2.f32 %v2360_v23 }
0x1179   :  { %2520 = vmatpush3.bf16.msra.mxu1 %v2618_v19 }
0x117a   :  { %2533 = vmatprep.subr.bf16.mxu1 %v2841_v0 }
0x1182   :  { %v2658_v25 = vpop.eup %2657 }
0x1183   :  { %v950_v27 = vadd.f32 1.0, %v2658_v25 }
0x1185   :  { %2659 = vrcp.f32 %v950_v27 }
0x118f   :  { %v2660_v28 = vpop.eup %2659 }
0x1190   :  { %v965_v34 = vsub.f32 1.0, %v2660_v28  ;;  %v971_v36 = vmul.f32 %v2660_v28, %v877_v10  ;;  %v1293_v10 = vpack.c.bf16 %v3194_v7, %v3194_v7 }
0x11e8   :  { %v956_v29 = vpop.permute.xlu0 %955 }
0x11e9   :  { %v958_v30 = vmul.f32 %v2660_v28, %v956_v29 }
0x11eb   :  { %960 = vrot.lane.b32.xlu1 %v958_v30, %s2837_s29 }
0x125d   :  { %v961_v31 = vpop.permute.xlu1 %960 }
0x125e   :  { %v963_v32 = vadd.f32 %v961_v31, %v900_v21  ;;  %v2363_v31 = vld [vmem:[#allocation11] ss:$0 sm:$0xff] }
0x1260   :  { %2661 = vtanh.f32 %v963_v32 }
0x126a   :  { %v2662_v33 = vpop.eup %2661 }
0x126b   :  { %967 = vrot.lane.b32.xlu0 %v2662_v33, %s2845_s4 }
0x12dd   :  { %v968_v35 = vpop.permute.xlu0 %967 }
0x12de   :  { %v970_v38 = vmul.f32 %v968_v35, %v965_v34 }
0x12e0   :  { %v3151_v39 = vadd.f32 %v971_v36, %v970_v38 }
0x12e2   :  { %v973_v40 = vpack.c.bf16 %v3151_v39, %v3151_v39 }
0x12e4   :  { %996 = vrot.lane.b32.xlu1 %v973_v40, %s2845_s4  ;;  %v981_v11 = vrot.slane %v973_v40, %v3027_v16 }
0x12e6   :  { %v988_v61 = vrot.slane %v981_v11, %v3027_v16  ;;  %v2846_v11 = vmov 1983009808  }
0x1356   :  { %v997_v41 = vpop.permute.xlu1 %996 }
0x1357   :  { %2514 = vmatmul.mubr.msk.bf16.vlgmr.msra.gmra.mrb[16].mxu0 %vm325_vm3, %v997_v41 }
0x1358   :  { %2529 = vmatprep.mubr.msk.bf16.mxu0 %vm2842_vm1, %v2841_v0  ;;  %2526 = vmatpush3.bf16.msra.mxu0 %v3185_v4 }
0x1359   :  { %2527 = vmatprep.subr.bf16.mxu0 %v2841_v0 }
0x135c   :  { %2528 = vmatpush3.bf16.msra.mxu0 %v3192_v5 }
0x135d   :  { %2541 = vmatprep.subr.bf16.mxu0 %v2841_v0 }
0x135f   :  { %2530 = vmatmul.mubr.msk.bf16.vlgmr.msra.gmra.mrb[20].mxu0 %vm325_vm3, %v1293_v10 }
0x1360   :  { %2542 = vmatpush3.bf16.msra.mxu0 %v3185_v4  ;;  %2545 = vmatprep.mubr.msk.bf16.mxu0 %vm2842_vm1, %v2841_v0 }
0x1361   :  { %2543 = vmatprep.subr.bf16.mxu0 %v2841_v0 }
0x1364   :  { %2544 = vmatpush3.bf16.msra.mxu0 %v3192_v5 }
0x1365   :  { %2557 = vmatprep.subr.bf16.mxu0 %v2841_v0 }
0x142a   :  { %v1035_v42 = vpop.f32.mrb[16].mxu0 }
0x142b   :  { %v2515_v43 = vpop.f32.mrb[17].mxu0  ;;  %v1048_v44 = vadd.f32 %v1035_v42, %v3030_v24  ;;  %v1041_v48 = vadd.f32 %v1035_v42, %v995_v47  ;;  %v418_v24 = vrot.slane %v411_v56, %v3027_v16 }
0x142c   :  { %v1038_v45 = vpop.f32.mrb[18].mxu0 }
0x142d   :  { %1050 = vrot.lane.b32.xlu0 %v1048_v44, %s2837_s29  ;;  %v2516_v46 = vpop.f32.mrb[19].mxu0  ;;  %v2362_v49 = vmul.f32 -1.442695, %v1041_v48 }
0x142f   :  { %2663 = vpow2.f32 %v2362_v49 }
0x1432   :  { %v3233_v32 = vpop.f32.mrb[20].mxu0 }
0x1433   :  { %v2531_v33 = vpop.f32.mrb[21].mxu0 }
0x1434   :  { %v1346_v34 = vpop.f32.mrb[22].mxu0 }
0x1435   :  { %v2532_v35 = vpop.f32.mrb[23].mxu0 }
0x1439   :  { %v2664_v51 = vpop.eup %2663 }
0x143a   :  { %v1045_v52 = vadd.f32 1.0, %v2664_v51 }
0x143c   :  { %2665 = vrcp.f32 %v1045_v52 }
0x1446   :  { %v2666_v53 = vpop.eup %2665 }
0x1447   :  { %v1060_v17 = vsub.f32 1.0, %v2666_v53  ;;  %v1066_v20 = vmul.f32 %v2666_v53, %v3151_v39 }
0x149f   :  { %v1051_v54 = vpop.permute.xlu0 %1050 }
0x14a0   :  { %v1053_v55 = vmul.f32 %v2666_v53, %v1051_v54 }
0x14a2   :  { %1055 = vrot.lane.b32.xlu1 %v1053_v55, %s2837_s29 }
0x14a6   :  { %419 = vrot.lane.b32.xlu1 %v418_v24, %s2845_s4 }
0x14aa   :  { %609 = vrot.lane.b32.xlu1 %v608_v58, %s2845_s4 }
0x14ae   :  { %799 = vrot.lane.b32.xlu1 %v798_v59, %s2845_s4 }
0x14b2   :  { %989 = vrot.lane.b32.xlu1 %v988_v61, %s2845_s4  ;;  %v1241_v61 = vunpack.c.l.s4 %v2846_v11 }
0x14b6   :  { %1356 = vrot.lane.b32.xlu1 %v2363_v31, %s2837_s29 }
0x1514   :  { %v1056_v60 = vpop.permute.xlu1 %1055 }
0x1515   :  { %v1058_v62 = vadd.f32 %v1056_v60, %v995_v47  ;;  %v1242_v60 = vunpack.c.0.s8 %v1241_v61 }
0x1517   :  { %2667 = vtanh.f32 %v1058_v62  ;;  %v2364_v62 = vld [vmem:[#allocation10] ss:$0 sm:$0xff] }
0x1518   :  { %v420_v63 = vpop.permute.xlu1 %419 }
0x1519   :  { %423 = vst.msk [vmem:[#allocation4] sm:$0x1] %vm422_vm5, %v420_v63  ;;  %v3255_v63 = vsub.s32 %v1242_v60, %v3021_v14 }
0x151c   :  { %v610_v50 = vpop.permute.xlu1 %609 }
0x151d   :  { %613 = vst.msk [vmem:[#allocation4 + $0x2] sm:$0x1] %vm422_vm5, %v610_v50 }
0x1520   :  { %v800_v6 = vpop.permute.xlu1 %799  ;;  %v1110_v42 = vld [vmem:[#allocation4] sm:$0x1] }
0x1521   :  { %v2668_v3 = vpop.eup %2667  ;;  %803 = vst.msk [vmem:[#allocation4 + $0x4] sm:$0x1] %vm422_vm5, %v800_v6 }
0x1522   :  { %1062 = vrot.lane.b32.xlu0 %v2668_v3, %s2845_s4 }
0x1524   :  { %v990_v37 = vpop.permute.xlu1 %989  ;;  %v1112_v40 = vld [vmem:[#allocation4 + $0x2] sm:$0x1] }
0x1525   :  { %993 = vst.msk [vmem:[#allocation4 + $0x6] sm:$0x1] %vm422_vm5, %v990_v37 }
0x1526   :  { %514 = vrot.lane.b32.xlu0 %v513_v8, %s2845_s4 }
0x1528   :  { %v1114_v45 = vld [vmem:[#allocation4 + $0x4] sm:$0x1]  ;;  %v3236_v46 = vpop.permute.xlu1 %1356 }
0x1529   :  { %v1359_v49 = vadd.f32 %v3236_v46, %v3233_v32 }
0x152a   :  { %704 = vrot.lane.b32.xlu0 %v703_v13, %s2845_s4 }
0x152c   :  { %v1116_v51 = vld [vmem:[#allocation4 + $0x6] sm:$0x1] }
0x152e   :  { %894 = vrot.lane.b32.xlu0 %v893_v26, %s2845_s4 }
0x1594   :  { %v1063_v18 = vpop.permute.xlu0 %1062 }
0x1595   :  { %v1065_v21 = vmul.f32 %v1063_v18, %v1060_v17 }
0x1597   :  { %v3221_v22 = vadd.f32 %v1066_v20, %v1065_v21 }
0x1598   :  { %v515_v23 = vpop.permute.xlu0 %514 }
0x1599   :  { %v1068_v25 = vpack.c.bf16 %v3221_v22, %v3221_v22  ;;  %518 = vst.msk [vmem:[#allocation4 + $0x1] sm:$0x1] %vm422_vm5, %v515_v23 }
0x159b   :  { %v1076_v27 = vrot.slane %v1068_v25, %v3027_v16 }
0x159c   :  { %v705_v28 = vpop.permute.xlu0 %704 }
0x159d   :  { %708 = vst.msk [vmem:[#allocation4 + $0x3] sm:$0x1] %vm422_vm5, %v705_v28  ;;  %v1083_v29 = vrot.slane %v1076_v27, %v3027_v16 }
0x159f   :  { %1084 = vrot.lane.b32.xlu0 %v1083_v29, %s2845_s4 }
0x15a0   :  { %v895_v30 = vpop.permute.xlu0 %894  ;;  %v1111_v39 = vld [vmem:[#allocation4 + $0x1] sm:$0x1] }
0x15a1   :  { %898 = vst.msk [vmem:[#allocation4 + $0x5] sm:$0x1] %vm422_vm5, %v895_v30  ;;  %v1132_v44 = vcombine.low %v1110_v42, %v1111_v39 }
0x15a3   :  { %v1142_v54 = vrot.slane %v1132_v44, %v3027_v16  ;;  %1361 = vrot.lane.b32.xlu0 %v1359_v49, %s2837_s29 }
0x15a4   :  { %v1113_v38 = vld [vmem:[#allocation4 + $0x3] sm:$0x1] }
0x15a5   :  { %v1133_v41 = vcombine.low %v1112_v40, %v1113_v38 }
0x15a7   :  { %v1149_v48 = vrot.slane %v1133_v41, %v3027_v16 }
0x15a8   :  { %v1115_v43 = vld [vmem:[#allocation4 + $0x5] sm:$0x1] }
0x15a9   :  { %v1134_v47 = vcombine.low %v1114_v45, %v1115_v43  ;;  %v1164_v24 = vcombine.low %v1142_v54, %v1149_v48 }
0x15ab   :  { %v1156_v55 = vrot.slane %v1134_v47, %v3027_v16  ;;  %v1172_v58 = vrot.slane %v1164_v24, %v3027_v16 }
0x1611   :  { %v1085_v36 = vpop.permute.xlu0 %1084 }
0x1612   :  { %1088 = vst.msk [vmem:[#allocation4 + $0x7] sm:$0x1] %vm422_vm5, %v1085_v36 }
0x1615   :  { %v1362_v29 = vpop.permute.xlu0 %1361 }
0x1619   :  { %v1117_v52 = vld [vmem:[#allocation4 + $0x7] sm:$0x1] }
0x161a   :  { %v1135_v53 = vcombine.low %v1116_v51, %v1117_v52 }
0x161c   :  { %v1163_v56 = vrot.slane %v1135_v53, %v3027_v16 }
0x161e   :  { %v1165_v57 = vcombine.low %v1156_v55, %v1163_v56 }
0x1620   :  { %v1179_v2 = vrot.slane %v1165_v57, %v3027_v16 }
0x1622   :  { %v1180_v59 = vcombine.low %v1172_v58, %v1179_v2 }
0x1624   :  { %2522 = vmatmul.mubr.msk.bf16.vlgmr.msra.gmra.mrb[16].mxu1 %vm325_vm3, %v1180_v59 }
0x1625   :  { %2534 = vmatpush3.bf16.msra.mxu1 %v3185_v4  ;;  %2537 = vmatprep.mubr.msk.bf16.mxu1 %vm2842_vm1, %v2841_v0 }
0x1626   :  { %2535 = vmatprep.subr.bf16.mxu1 %v2841_v0 }
0x1629   :  { %2536 = vmatpush3.bf16.msra.mxu1 %v3192_v5 }
0x162a   :  { %2549 = vmatprep.subr.bf16.mxu1 %v2841_v0 }
0x16f7   :  { %v1230_v50 = vpop.f32.mrb[16].mxu1 }
0x16f8   :  { %v1231_v6 = vadd.f32 %v2364_v62, %v1230_v50  ;;  %v2523_v1 = vpop.f32.mrb[17].mxu1 }
0x16f9   :  { %v1233_v3 = vpop.f32.mrb[18].mxu1 }
0x16fa   :  { %v1239_v37 = vcombine.high %v1231_v6, %v1231_v6  ;;  %v1246_v8 = vrot.slane %v1231_v6, %v3255_v63  ;;  %v1234_v9 = vadd.f32 %v2364_v62, %v1233_v3  ;;  %v2524_v10 = vpop.f32.mrb[19].mxu1 }
0x16fc   :  { %v1253_v13 = vrot.slane %v1239_v37, %v3255_v63  ;;  %v1254_v15 = vcombine.high %v1246_v8, %v1246_v8  ;;  %1282 = vst.msk [vmem:[#allocation3] sm:$0x3] %vm1281_vm6, %v1246_v8  ;;  %v1256_v26 = vcombine.high %v1234_v9, %v1234_v9  ;;  %v1263_v12 = vrot.slane %v1234_v9, %v3255_v63 }
0x16fe   :  { %v1255_v17 = vcombine.high %v1253_v13, %v1253_v13  ;;  %1283 = vst.msk [vmem:[#allocation3 + $0x2] sm:$0x3] %vm1281_vm6, %v1254_v15  ;;  %1284 = vst.msk [vmem:[#allocation3 + $0x4] sm:$0x3] %vm1281_vm6, %v1253_v13  ;;  %v1270_v18 = vrot.slane %v1256_v26, %v3255_v63  ;;  %v1271_v19 = vcombine.high %v1263_v12, %v1263_v12 }
0x16ff   :  { %1286 = vst.msk [vmem:[#allocation3 + $0x8] sm:$0x3] %vm1281_vm6, %v1263_v12 }
0x1700   :  { %1285 = vst.msk [vmem:[#allocation3 + $0x6] sm:$0x3] %vm1281_vm6, %v1255_v17  ;;  %v1272_v20 = vcombine.high %v1270_v18, %v1270_v18  ;;  %1287 = vst.msk [vmem:[#allocation3 + $0xa] sm:$0x3] %vm1281_vm6, %v1271_v19 }
0x1701   :  { %1288 = vst.msk [vmem:[#allocation3 + $0xc] sm:$0x3] %vm1281_vm6, %v1270_v18 }
0x1702   :  { %1289 = vst.msk [vmem:[#allocation3 + $0xe] sm:$0x3] %vm1281_vm6, %v1272_v20 }
0x1703   :  { %v1292_v21 = vld [vmem:[#allocation3] sm:$0x3] }
0x1704   :  { %v1349_v23 = vadd.f32 %v3233_v32, %v1292_v21 }
0x1705   :  { %v1403_v49 = vld [vmem:[#allocation3 + $0x2] sm:$0x3]  ;;  %v1496_v10 = vld [vmem:[#allocation3 + $0x4] sm:$0x3] }
0x1706   :  { %v2371_v25 = vmul.f32 -1.442695, %v1349_v23 }
0x1708   :  { %2669 = vpow2.f32 %v2371_v25 }
0x1712   :  { %v2670_v27 = vpop.eup %2669 }
0x1713   :  { %v1353_v28 = vadd.f32 1.0, %v2670_v27 }
0x1715   :  { %2671 = vrcp.f32 %v1353_v28 }
0x171f   :  { %v2672_v30 = vpop.eup %2671 }
0x1720   :  { %v1364_v31 = vmul.f32 %v2672_v30, %v1362_v29  ;;  %v1371_v36 = vsub.f32 1.0, %v2672_v30 }
0x1722   :  { %1366 = vrot.lane.b32.xlu1 %v1364_v31, %s2837_s29 }
0x1726   :  { %1378 = vrot.lane.b32.xlu1 %v3194_v7, %s2844_s3 }
0x1794   :  { %v1367_v33 = vpop.permute.xlu1 %1366 }
0x1795   :  { %v1369_v34 = vadd.f32 %v1367_v33, %v1292_v21 }
0x1797   :  { %2673 = vtanh.f32 %v1369_v34 }
0x1798   :  { %v1379_v32 = vpop.permute.xlu1 %1378 }
0x1799   :  { %v1381_v39 = vmul.f32 %v2672_v30, %v1379_v32 }
0x17a1   :  { %v2674_v35 = vpop.eup %2673 }
0x17a2   :  { %1373 = vrot.lane.b32.xlu0 %v2674_v35, %s2845_s4 }
0x1814   :  { %v1374_v38 = vpop.permute.xlu0 %1373 }
0x1815   :  { %v1376_v40 = vmul.f32 %v1374_v38, %v1371_v36 }
0x1817   :  { %v1382_v41 = vadd.f32 %v1381_v39, %v1376_v40  ;;  %v1589_v39 = vld [vmem:[#allocation3 + $0x6] sm:$0x3] }
0x1819   :  { %v3274_v42 = vpack.c.bf16 %v1382_v41, %v1382_v41 }
0x181b   :  { %1404 = vrot.lane.b32.xlu0 %v3274_v42, %s2845_s4 }
0x188d   :  { %v1405_v43 = vpop.permute.xlu0 %1404 }
0x188e   :  { %2538 = vmatmul.mubr.msk.bf16.vlgmr.msra.gmra.mrb[20].mxu1 %vm325_vm3, %v1405_v43 }
0x188f   :  { %2550 = vmatpush3.bf16.msra.mxu1 %v3185_v4  ;;  %2553 = vmatprep.mubr.msk.bf16.mxu1 %vm2842_vm1, %v2841_v0 }
0x1890   :  { %2551 = vmatprep.subr.bf16.mxu1 %v2841_v0 }
0x1893   :  { %2552 = vmatpush3.bf16.msra.mxu1 %v3192_v5 }
0x1894   :  { %2565 = vmatprep.subr.bf16.mxu1 %v2841_v0 }
0x1961   :  { %v1443_v7 = vpop.f32.mrb[20].mxu1 }
0x1962   :  { %v2539_v44 = vpop.f32.mrb[21].mxu1  ;;  %v1456_v45 = vadd.f32 %v1443_v7, %v3236_v46  ;;  %v1449_v51 = vadd.f32 %v1443_v7, %v1403_v49 }
0x1963   :  { %v1446_v47 = vpop.f32.mrb[22].mxu1 }
0x1964   :  { %1458 = vrot.lane.b32.xlu1 %v1456_v45, %s2837_s29  ;;  %v2540_v48 = vpop.f32.mrb[23].mxu1  ;;  %v2373_v52 = vmul.f32 -1.442695, %v1449_v51 }
0x1966   :  { %2675 = vpow2.f32 %v2373_v52 }
0x1970   :  { %v2676_v53 = vpop.eup %2675 }
0x1971   :  { %v1453_v54 = vadd.f32 1.0, %v2676_v53 }
0x1973   :  { %2677 = vrcp.f32 %v1453_v54 }
0x197d   :  { %v2678_v55 = vpop.eup %2677 }
0x197e   :  { %v1468_v59 = vsub.f32 1.0, %v2678_v55  ;;  %v1474_v61 = vmul.f32 %v2678_v55, %v1382_v41 }
0x19d6   :  { %v1459_v56 = vpop.permute.xlu1 %1458 }
0x19d7   :  { %v1461_v24 = vmul.f32 %v2678_v55, %v1459_v56 }
0x19d9   :  { %1463 = vrot.lane.b32.xlu0 %v1461_v24, %s2837_s29 }
0x1a4b   :  { %v1464_v57 = vpop.permute.xlu0 %1463 }
0x1a4c   :  { %v1466_v58 = vadd.f32 %v1464_v57, %v1403_v49 }
0x1a4e   :  { %2679 = vtanh.f32 %v1466_v58 }
0x1a58   :  { %v2680_v2 = vpop.eup %2679 }
0x1a59   :  { %1470 = vrot.lane.b32.xlu1 %v2680_v2, %s2845_s4 }
0x1acb   :  { %v1471_v11 = vpop.permute.xlu1 %1470 }
0x1acc   :  { %v1473_v60 = vmul.f32 %v1471_v11, %v1468_v59 }
0x1ace   :  { %v1475_v62 = vadd.f32 %v1474_v61, %v1473_v60  ;;  %v1682_v60 = vld [vmem:[#allocation3 + $0x8] sm:$0x3] }
0x1ad0   :  { %v3289_v50 = vpack.c.bf16 %v1475_v62, %v1475_v62 }
0x1ad2   :  { %1497 = vrot.lane.b32.xlu0 %v3289_v50, %s2845_s4 }
0x1b44   :  { %v1498_v6 = vpop.permute.xlu0 %1497 }
0x1b45   :  { %2546 = vmatmul.mubr.msk.bf16.vlgmr.msra.gmra.mrb[24].mxu0 %vm325_vm3, %v1498_v6 }
0x1b46   :  { %2558 = vmatpush3.bf16.msra.mxu0 %v3185_v4  ;;  %2561 = vmatprep.mubr.msk.bf16.mxu0 %vm2842_vm1, %v2841_v0 }
0x1b47   :  { %2559 = vmatprep.subr.bf16.mxu0 %v2841_v0 }
0x1b4a   :  { %2560 = vmatpush3.bf16.msra.mxu0 %v3192_v5 }
0x1b4b   :  { %2573 = vmatprep.subr.bf16.mxu0 %v2841_v0 }
0x1c18   :  { %v1536_v1 = vpop.f32.mrb[24].mxu0 }
0x1c19   :  { %v2547_v3 = vpop.f32.mrb[25].mxu0  ;;  %v1549_v37 = vadd.f32 %v1536_v1, %v3236_v46  ;;  %v1542_v13 = vadd.f32 %v1536_v1, %v1496_v10 }
0x1c1a   :  { %v1539_v8 = vpop.f32.mrb[26].mxu0 }
0x1c1b   :  { %1551 = vrot.lane.b32.xlu1 %v1549_v37, %s2837_s29  ;;  %v2548_v9 = vpop.f32.mrb[27].mxu0  ;;  %v2375_v15 = vmul.f32 -1.442695, %v1542_v13 }
0x1c1d   :  { %2681 = vpow2.f32 %v2375_v15 }
0x1c27   :  { %v2682_v26 = vpop.eup %2681 }
0x1c28   :  { %v1546_v12 = vadd.f32 1.0, %v2682_v26 }
0x1c2a   :  { %2683 = vrcp.f32 %v1546_v12 }
0x1c34   :  { %v2684_v17 = vpop.eup %2683 }
0x1c35   :  { %v1561_v25 = vsub.f32 1.0, %v2684_v17  ;;  %v1567_v28 = vmul.f32 %v2684_v17, %v1475_v62 }
0x1c8d   :  { %v1552_v18 = vpop.permute.xlu1 %1551 }
0x1c8e   :  { %v1554_v19 = vmul.f32 %v2684_v17, %v1552_v18 }
0x1c90   :  { %1556 = vrot.lane.b32.xlu0 %v1554_v19, %s2837_s29 }
0x1d02   :  { %v1557_v20 = vpop.permute.xlu0 %1556 }
0x1d03   :  { %v1559_v21 = vadd.f32 %v1557_v20, %v1496_v10 }
0x1d05   :  { %2685 = vtanh.f32 %v1559_v21 }
0x1d0f   :  { %v2686_v23 = vpop.eup %2685 }
0x1d10   :  { %1563 = vrot.lane.b32.xlu1 %v2686_v23, %s2845_s4 }
0x1d82   :  { %v1564_v27 = vpop.permute.xlu1 %1563 }
0x1d83   :  { %v1566_v29 = vmul.f32 %v1564_v27, %v1561_v25 }
0x1d85   :  { %v1568_v30 = vadd.f32 %v1567_v28, %v1566_v29 }
0x1d87   :  { %v3304_v31 = vpack.c.bf16 %v1568_v30, %v1568_v30 }
0x1d89   :  { %1590 = vrot.lane.b32.xlu0 %v3304_v31, %s2845_s4 }
0x1dfb   :  { %v1591_v33 = vpop.permute.xlu0 %1590 }
0x1dfc   :  { %2554 = vmatmul.mubr.msk.bf16.vlgmr.msra.gmra.mrb[24].mxu1 %vm325_vm3, %v1591_v33 }
0x1dfd   :  { %2566 = vmatpush3.bf16.msra.mxu1 %v3185_v4  ;;  %2569 = vmatprep.mubr.msk.bf16.mxu1 %vm2842_vm1, %v2841_v0 }
0x1dfe   :  { %2567 = vmatprep.subr.bf16.mxu1 %v2841_v0 }
0x1e01   :  { %2568 = vmatpush3.bf16.msra.mxu1 %v3192_v5 }
0x1e02   :  { %2581 = vmatprep.subr.bf16.mxu1 %v2841_v0 }
0x1ecf   :  { %v1629_v34 = vpop.f32.mrb[24].mxu1 }
0x1ed0   :  { %v2555_v35 = vpop.f32.mrb[25].mxu1  ;;  %v1642_v32 = vadd.f32 %v1629_v34, %v3236_v46  ;;  %v1635_v40 = vadd.f32 %v1629_v34, %v1589_v39 }
0x1ed1   :  { %v1632_v36 = vpop.f32.mrb[26].mxu1 }
0x1ed2   :  { %1644 = vrot.lane.b32.xlu1 %v1642_v32, %s2837_s29  ;;  %v2556_v38 = vpop.f32.mrb[27].mxu1  ;;  %v2377_v41 = vmul.f32 -1.442695, %v1635_v40 }
0x1ed4   :  { %2687 = vpow2.f32 %v2377_v41 }
0x1ede   :  { %v2688_v43 = vpop.eup %2687 }
0x1edf   :  { %v1639_v7 = vadd.f32 1.0, %v2688_v43 }
0x1ee1   :  { %2689 = vrcp.f32 %v1639_v7 }
0x1eeb   :  { %v2690_v44 = vpop.eup %2689 }
0x1eec   :  { %v1654_v52 = vsub.f32 1.0, %v2690_v44  ;;  %v1660_v54 = vmul.f32 %v2690_v44, %v1568_v30  ;;  %v1775_v30 = vld [vmem:[#allocation3 + $0xa] sm:$0x3] }
0x1f44   :  { %v1645_v45 = vpop.permute.xlu1 %1644 }
0x1f45   :  { %v1647_v47 = vmul.f32 %v2690_v44, %v1645_v45 }
0x1f47   :  { %1649 = vrot.lane.b32.xlu0 %v1647_v47, %s2837_s29 }
0x1fb9   :  { %v1650_v48 = vpop.permute.xlu0 %1649 }
0x1fba   :  { %v1652_v49 = vadd.f32 %v1650_v48, %v1589_v39 }
0x1fbc   :  { %2691 = vtanh.f32 %v1652_v49 }
0x1fc6   :  { %v2692_v51 = vpop.eup %2691 }
0x1fc7   :  { %1656 = vrot.lane.b32.xlu1 %v2692_v51, %s2845_s4 }
0x2039   :  { %v1657_v53 = vpop.permute.xlu1 %1656 }
0x203a   :  { %v1659_v55 = vmul.f32 %v1657_v53, %v1654_v52 }
0x203c   :  { %v1661_v56 = vadd.f32 %v1660_v54, %v1659_v55  ;;  %v1868_v55 = vld [vmem:[#allocation3 + $0xc] sm:$0x3] }
0x203e   :  { %v3319_v24 = vpack.c.bf16 %v1661_v56, %v1661_v56 }
0x2040   :  { %1683 = vrot.lane.b32.xlu0 %v3319_v24, %s2845_s4 }
0x20b2   :  { %v1684_v57 = vpop.permute.xlu0 %1683 }
0x20b3   :  { %2562 = vmatmul.mubr.msk.bf16.vlgmr.msra.gmra.mrb[28].mxu0 %vm325_vm3, %v1684_v57 }
0x20b4   :  { %2574 = vmatpush3.bf16.msra.mxu0 %v3185_v4  ;;  %2577 = vmatprep.mubr.msk.bf16.mxu0 %vm2842_vm1, %v2841_v0 }
0x20b5   :  { %2575 = vmatprep.subr.bf16.mxu0 %v2841_v0 }
0x20b8   :  { %2576 = vmatpush3.bf16.msra.mxu0 %v3192_v5 }
0x20b9   :  { %2589 = vmatprep.subr.bf16.mxu0 %v2841_v0 }
0x2186   :  { %v1722_v58 = vpop.f32.mrb[28].mxu0 }
0x2187   :  { %v2563_v2 = vpop.f32.mrb[29].mxu0  ;;  %v1735_v59 = vadd.f32 %v1722_v58, %v3236_v46  ;;  %v1728_v62 = vadd.f32 %v1722_v58, %v1682_v60 }
0x2188   :  { %v1725_v11 = vpop.f32.mrb[30].mxu0 }
0x2189   :  { %1737 = vrot.lane.b32.xlu1 %v1735_v59, %s2837_s29  ;;  %v2564_v61 = vpop.f32.mrb[31].mxu0  ;;  %v2379_v6 = vmul.f32 -1.442695, %v1728_v62 }
0x218b   :  { %2693 = vpow2.f32 %v2379_v6 }
0x2195   :  { %v2694_v1 = vpop.eup %2693 }
0x2196   :  { %v1732_v3 = vadd.f32 1.0, %v2694_v1 }
0x2198   :  { %2695 = vrcp.f32 %v1732_v3 }
0x21a2   :  { %v2696_v37 = vpop.eup %2695 }
0x21a3   :  { %v1747_v26 = vsub.f32 1.0, %v2696_v37  ;;  %v1753_v17 = vmul.f32 %v2696_v37, %v1661_v56 }
0x21fb   :  { %v1738_v8 = vpop.permute.xlu1 %1737 }
0x21fc   :  { %v1740_v9 = vmul.f32 %v2696_v37, %v1738_v8 }
0x21fe   :  { %1742 = vrot.lane.b32.xlu0 %v1740_v9, %s2837_s29 }
0x2270   :  { %v1743_v10 = vpop.permute.xlu0 %1742 }
0x2271   :  { %v1745_v13 = vadd.f32 %v1743_v10, %v1682_v60 }
0x2273   :  { %2697 = vtanh.f32 %v1745_v13 }
0x227d   :  { %v2698_v15 = vpop.eup %2697 }
0x227e   :  { %1749 = vrot.lane.b32.xlu1 %v2698_v15, %s2845_s4 }
0x22f0   :  { %v1750_v12 = vpop.permute.xlu1 %1749 }
0x22f1   :  { %v1752_v18 = vmul.f32 %v1750_v12, %v1747_v26 }
0x22f3   :  { %v1754_v19 = vadd.f32 %v1753_v17, %v1752_v18 }
0x22f5   :  { %v3334_v20 = vpack.c.bf16 %v1754_v19, %v1754_v19 }
0x22f7   :  { %1776 = vrot.lane.b32.xlu0 %v3334_v20, %s2845_s4 }
0x2369   :  { %v1777_v21 = vpop.permute.xlu0 %1776 }
0x236a   :  { %2570 = vmatmul.mubr.msk.bf16.vlgmr.msra.gmra.mrb[28].mxu1 %vm325_vm3, %v1777_v21 }
0x236b   :  { %2582 = vmatpush3.bf16.msra.mxu1 %v3185_v4  ;;  %2585 = vmatprep.mubr.msk.bf16.mxu1 %vm2842_vm1, %v2841_v0 }
0x236c   :  { %2583 = vmatprep.subr.bf16.mxu1 %v2841_v0 }
0x236f   :  { %2584 = vmatpush3.bf16.msra.mxu1 %v3192_v5 }
0x243d   :  { %v1815_v23 = vpop.f32.mrb[28].mxu1 }
0x243e   :  { %v2571_v25 = vpop.f32.mrb[29].mxu1  ;;  %v1828_v27 = vadd.f32 %v1815_v23, %v3236_v46  ;;  %v1821_v33 = vadd.f32 %v1815_v23, %v1775_v30 }
0x243f   :  { %v1818_v28 = vpop.f32.mrb[30].mxu1 }
0x2440   :  { %1830 = vrot.lane.b32.xlu1 %v1828_v27, %s2837_s29  ;;  %v2572_v29 = vpop.f32.mrb[31].mxu1  ;;  %v2381_v34 = vmul.f32 -1.442695, %v1821_v33  ;;  %v1391_v33 = vrot.slane %v3274_v42, %v3027_v16 }
0x2442   :  { %2699 = vpow2.f32 %v2381_v34  ;;  %v1577_v34 = vrot.slane %v3304_v31, %v3027_v16 }
0x244c   :  { %v2700_v4 = vpop.eup %2699 }
0x244d   :  { %v1825_v35 = vadd.f32 1.0, %v2700_v4  ;;  %v1584_v4 = vrot.slane %v1577_v34, %v3027_v16  ;;  %v2278_v34 = vsub.s32 1, %v3021_v14 }
0x244f   :  { %2701 = vrcp.f32 %v1825_v35  ;;  %v1763_v35 = vrot.slane %v3334_v20, %v3027_v16 }
0x2459   :  { %v2702_v32 = vpop.eup %2701 }
0x245a   :  { %v1840_v41 = vsub.f32 1.0, %v2702_v32  ;;  %v1846_v7 = vmul.f32 %v2702_v32, %v1754_v19  ;;  %v1961_v19 = vld [vmem:[#allocation3 + $0xe] sm:$0x3] }
0x24b2   :  { %v1831_v36 = vpop.permute.xlu1 %1830 }
0x24b3   :  { %v1833_v38 = vmul.f32 %v2702_v32, %v1831_v36  ;;  %v1770_v32 = vrot.slane %v1763_v35, %v3027_v16 }
0x24b5   :  { %1835 = vrot.lane.b32.xlu0 %v1833_v38, %s2837_s29 }
0x2527   :  { %v1836_v5 = vpop.permute.xlu0 %1835 }
0x2528   :  { %v1838_v39 = vadd.f32 %v1836_v5, %v1775_v30 }
0x252a   :  { %2703 = vtanh.f32 %v1838_v39 }
0x2534   :  { %v2704_v40 = vpop.eup %2703 }
0x2535   :  { %1842 = vrot.lane.b32.xlu1 %v2704_v40, %s2845_s4  ;;  %v1484_v40 = vrot.slane %v3289_v50, %v3027_v16 }
0x25a7   :  { %v1843_v43 = vpop.permute.xlu1 %1842 }
0x25a8   :  { %v1845_v44 = vmul.f32 %v1843_v43, %v1840_v41 }
0x25aa   :  { %v1847_v45 = vadd.f32 %v1846_v7, %v1845_v44  ;;  %v1670_v7 = vrot.slane %v3319_v24, %v3027_v16 }
0x25ac   :  { %v3348_v47 = vpack.c.bf16 %v1847_v45, %v1847_v45 }
0x25ae   :  { %1869 = vrot.lane.b32.xlu0 %v3348_v47, %s2845_s4  ;;  %v1856_v50 = vrot.slane %v3348_v47, %v3027_v16  ;;  %v2620_v47 = vld [vmem:[%s3466_s9 + $0x8] sm:$0xff]  }
0x2620   :  { %v1870_v48 = vpop.permute.xlu0 %1869 }
0x2621   :  { %2578 = vmatmul.mubr.msk.bf16.vlgmr.msra.gmra.mrb[32].mxu0 %vm325_vm3, %v1870_v48  ;;  %v1863_v48 = vrot.slane %v1856_v50, %v3027_v16 }
0x2622   :  { %2593 = vmatprep.mubr.msk.bf16.mxu0 %vm2842_vm1, %v2841_v0 }
0x26f4   :  { %v1908_v49 = vpop.f32.mrb[32].mxu0 }
0x26f5   :  { %v2579_v51 = vpop.f32.mrb[33].mxu0  ;;  %v1921_v52 = vadd.f32 %v1908_v49, %v3236_v46  ;;  %v1914_v56 = vadd.f32 %v1908_v49, %v1868_v55 }
0x26f6   :  { %v1911_v53 = vpop.f32.mrb[34].mxu0 }
0x26f7   :  { %1923 = vrot.lane.b32.xlu1 %v1921_v52, %s2837_s29  ;;  %v2580_v54 = vpop.f32.mrb[35].mxu0  ;;  %v2383_v57 = vmul.f32 -1.442695, %v1914_v56  ;;  %v2619_v53 = vld [vmem:[%s3466_s9] sm:$0xff]  }
0x26f8   :  { %2590 = vmatpush3.bf16.msra.mxu0 %v2619_v53 }
0x26f9   :  { %2705 = vpow2.f32 %v2383_v57  ;;  %2591 = vmatprep.subr.bf16.mxu0 %v2841_v0 }
0x26fc   :  { %2592 = vmatpush3.bf16.msra.mxu0 %v2620_v47 }
0x2703   :  { %v2706_v58 = vpop.eup %2705 }
0x2704   :  { %v1918_v2 = vadd.f32 1.0, %v2706_v58 }
0x2706   :  { %2707 = vrcp.f32 %v1918_v2 }
0x2710   :  { %v2708_v59 = vpop.eup %2707 }
0x2711   :  { %v1933_v1 = vsub.f32 1.0, %v2708_v59  ;;  %v1939_v37 = vmul.f32 %v2708_v59, %v1847_v45  ;;  %v1677_v45 = vrot.slane %v1670_v7, %v3027_v16 }
0x2769   :  { %v1924_v11 = vpop.permute.xlu1 %1923 }
0x276a   :  { %v1926_v61 = vmul.f32 %v2708_v59, %v1924_v11 }
0x276c   :  { %1928 = vrot.lane.b32.xlu0 %v1926_v61, %s2837_s29 }
0x27de   :  { %v1929_v60 = vpop.permute.xlu0 %1928 }
0x27df   :  { %v1931_v62 = vadd.f32 %v1929_v60, %v1868_v55 }
0x27e1   :  { %2709 = vtanh.f32 %v1931_v62 }
0x27eb   :  { %v2710_v6 = vpop.eup %2709 }
0x27ec   :  { %1935 = vrot.lane.b32.xlu1 %v2710_v6, %s2845_s4 }
0x285e   :  { %v1936_v3 = vpop.permute.xlu1 %1935 }
0x285f   :  { %v1938_v8 = vmul.f32 %v1936_v3, %v1933_v1 }
0x2861   :  { %v1940_v9 = vadd.f32 %v1939_v37, %v1938_v8 }
0x2863   :  { %v1941_v10 = vpack.c.bf16 %v1940_v9, %v1940_v9 }
0x2865   :  { %1962 = vrot.lane.b32.xlu0 %v1941_v10, %s2845_s4  ;;  %v1949_v42 = vrot.slane %v1941_v10, %v3027_v16 }
0x2867   :  { %v1956_v36 = vrot.slane %v1949_v42, %v3027_v16 }
0x28d7   :  { %v1963_v13 = vpop.permute.xlu0 %1962 }
0x28d8   :  { %2586 = vmatmul.mubr.msk.bf16.vlgmr.msra.gmra.mrb[32].mxu1 %vm325_vm3, %v1963_v13 }
0x29ab   :  { %v2001_v15 = vpop.f32.mrb[32].mxu1 }
0x29ac   :  { %v2587_v26 = vpop.f32.mrb[33].mxu1  ;;  %v2014_v12 = vadd.f32 %v2001_v15, %v3236_v46  ;;  %v2007_v21 = vadd.f32 %v2001_v15, %v1961_v19  ;;  %v1398_v46 = vrot.slane %v1391_v33, %v3027_v16 }
0x29ad   :  { %v2004_v17 = vpop.f32.mrb[34].mxu1 }
0x29ae   :  { %2016 = vrot.lane.b32.xlu1 %v2014_v12, %s2837_s29  ;;  %v2588_v18 = vpop.f32.mrb[35].mxu1  ;;  %v2385_v23 = vmul.f32 -1.442695, %v2007_v21 }
0x29b0   :  { %2711 = vpow2.f32 %v2385_v23 }
0x29ba   :  { %v2712_v25 = vpop.eup %2711 }
0x29bb   :  { %v2011_v27 = vadd.f32 1.0, %v2712_v25 }
0x29bd   :  { %2713 = vrcp.f32 %v2011_v27 }
0x29c7   :  { %v2714_v28 = vpop.eup %2713 }
0x29c8   :  { %v2026_v49 = vsub.f32 1.0, %v2714_v28  ;;  %v2032_v51 = vmul.f32 %v2714_v28, %v1940_v9 }
0x2a20   :  { %v2017_v29 = vpop.permute.xlu1 %2016 }
0x2a21   :  { %v2019_v30 = vmul.f32 %v2714_v28, %v2017_v29  ;;  %v2386_v28 = vld [vmem:[%s3467_s10] ss:$0 sm:$0xff]  ;;  %s2847_s10 = smov [#allocation13]  }
0x2a22   :  { %s2326_s26 = sshll.u32 %s2847_s10, 4  ;;  %s2327_s26 = int_to_ptr.vmem [resolvable:$true] %s2326_s26 }
0x2a23   :  { %2021 = vrot.lane.b32.xlu0 %v2019_v30, %s2837_s29  ;;  %s2805_s28 = scalar_lea.vmem %s2327_s26, 256  ;;  %p2810_p5 = scmp.lt.s32.totalorder %s2327_s26, %s2327_s26 }
0x2a24   :  { %p2806_p4 = scmp.ne.s32.totalorder %s2327_s26, %s2805_s28  ;;  %p2811_p6 = scmp.lt.s32.totalorder %s2805_s28, %s2805_s28 }
0x2a26   :  { %p2812_p7 = por %p2811_p6, %p2810_p5 }
0x2a27   :  { %1399 = vrot.lane.b32.xlu0 %v1398_v46, %s2845_s4  ;;  %v2229_v46 = vsub.s32 0, %v3021_v14 }
0x2a28   :  { %p2813_p8 = pnand %p2812_p7, %p2806_p4 }
0x2a2b   :  { %1585 = vrot.lane.b32.xlu0 %v1584_v4, %s2845_s4 }
0x2a2f   :  { %1771 = vrot.lane.b32.xlu0 %v1770_v32, %s2845_s4 }
0x2a33   :  { %1957 = vrot.lane.b32.xlu0 %v1956_v36, %s2845_s4 }
0x2a37   :  { %1090 = vrot.lane.b32.xlu0 %v3221_v22, %s2845_s4  ;;  %v1491_v22 = vrot.slane %v1484_v40, %v3027_v16 }
0x2a95   :  { %v2022_v31 = vpop.permute.xlu0 %2021 }
0x2a96   :  { %v2024_v38 = vadd.f32 %v2022_v31, %v1961_v19 }
0x2a98   :  { %2715 = vtanh.f32 %v2024_v38 }
0x2a99   :  { %v1400_v5 = vpop.permute.xlu0 %1399 }
0x2a9a   :  { %1402 = vst.msk [vmem:[#allocation4] sm:$0x1] %vm422_vm5, %v1400_v5 }
0x2a9d   :  { %v1586_v20 = vpop.permute.xlu0 %1585 }
0x2a9e   :  { %1588 = vst.msk [vmem:[#allocation4 + $0x2] sm:$0x1] %vm422_vm5, %v1586_v20 }
0x2aa1   :  { %v1772_v39 = vpop.permute.xlu0 %1771  ;;  %v2064_v1 = vld [vmem:[#allocation4] sm:$0x1] }
0x2aa2   :  { %v2716_v41 = vpop.eup %2715  ;;  %1774 = vst.msk [vmem:[#allocation4 + $0x4] sm:$0x1] %vm422_vm5, %v1772_v39 }
0x2aa3   :  { %2028 = vrot.lane.b32.xlu1 %v2716_v41, %s2845_s4 }
0x2aa5   :  { %v1958_v43 = vpop.permute.xlu0 %1957  ;;  %v2066_v60 = vld [vmem:[#allocation4 + $0x2] sm:$0x1] }
0x2aa6   :  { %1960 = vst.msk [vmem:[#allocation4 + $0x6] sm:$0x1] %vm422_vm5, %v1958_v43 }
0x2aa7   :  { %1492 = vrot.lane.b32.xlu1 %v1491_v22, %s2845_s4 }
0x2aa9   :  { %v1091_v44 = vpop.permute.xlu0 %1090  ;;  %v2068_v8 = vld [vmem:[#allocation4 + $0x4] sm:$0x1] }
0x2aaa   :  { %1094 = vst.msk [vmem:[#allocation2] sm:$0x3] %vm95_vm0, %v1091_v44 }
0x2aab   :  { %1678 = vrot.lane.b32.xlu1 %v1677_v45, %s2845_s4 }
0x2aad   :  { %v2070_v13 = vld [vmem:[#allocation4 + $0x6] sm:$0x1] }
0x2aaf   :  { %1864 = vrot.lane.b32.xlu1 %v1863_v48, %s2845_s4 }
0x2b15   :  { %v2029_v24 = vpop.permute.xlu1 %2028 }
0x2b16   :  { %v2031_v52 = vmul.f32 %v2029_v24, %v2026_v49 }
0x2b18   :  { %v2033_v54 = vadd.f32 %v2032_v51, %v2031_v52 }
0x2b19   :  { %v1493_v55 = vpop.permute.xlu1 %1492 }
0x2b1a   :  { %v2034_v56 = vpack.c.bf16 %v2033_v54, %v2033_v54  ;;  %1495 = vst.msk [vmem:[#allocation4 + $0x1] sm:$0x1] %vm422_vm5, %v1493_v55 }
0x2b1c   :  { %v2042_v57 = vrot.slane %v2034_v56, %v3027_v16 }
0x2b1d   :  { %v1679_v58 = vpop.permute.xlu1 %1678 }
0x2b1e   :  { %1681 = vst.msk [vmem:[#allocation4 + $0x3] sm:$0x1] %vm422_vm5, %v1679_v58  ;;  %v2049_v2 = vrot.slane %v2042_v57, %v3027_v16 }
0x2b20   :  { %2050 = vrot.lane.b32.xlu1 %v2049_v2, %s2845_s4 }
0x2b21   :  { %v1865_v59 = vpop.permute.xlu1 %1864  ;;  %v2065_v0 = vld [vmem:[#allocation4 + $0x1] sm:$0x1] }
0x2b22   :  { %1867 = vst.msk [vmem:[#allocation4 + $0x5] sm:$0x1] %vm422_vm5, %v1865_v59  ;;  %v2086_v37 = vcombine.low %v2064_v1, %v2065_v0 }
0x2b24   :  { %2055 = vrot.lane.b32.xlu1 %v2033_v54, %s2845_s4  ;;  %v2096_v12 = vrot.slane %v2086_v37, %v3027_v16 }
0x2b25   :  { %v2067_v61 = vld [vmem:[#allocation4 + $0x3] sm:$0x1] }
0x2b26   :  { %v2087_v62 = vcombine.low %v2066_v60, %v2067_v61 }
0x2b28   :  { %v2103_v10 = vrot.slane %v2087_v62, %v3027_v16 }
0x2b29   :  { %v2069_v3 = vld [vmem:[#allocation4 + $0x5] sm:$0x1] }
0x2b2a   :  { %v2088_v9 = vcombine.low %v2068_v8, %v2069_v3  ;;  %v2118_v19 = vcombine.low %v2096_v12, %v2103_v10 }
0x2b2c   :  { %v2110_v17 = vrot.slane %v2088_v9, %v3027_v16  ;;  %v2126_v23 = vrot.slane %v2118_v19, %v3027_v16 }
0x2b92   :  { %v2051_v11 = vpop.permute.xlu1 %2050 }
0x2b93   :  { %2053 = vst.msk [vmem:[#allocation4 + $0x7] sm:$0x1] %vm422_vm5, %v2051_v11 }
0x2b96   :  { %v2056_v6 = vpop.permute.xlu1 %2055 }
0x2b97   :  { %2058 = vst.msk [vmem:[#allocation2 + $0x2] sm:$0x3] %vm95_vm0, %v2056_v6  ;;  %vm2317_vm0 = vcmask 195585  }
0x2b9a   :  { %v2071_v15 = vld [vmem:[#allocation4 + $0x7] sm:$0x1] }
0x2b9b   :  { %v2089_v26 = vcombine.low %v2070_v13, %v2071_v15 }
0x2b9d   :  { %v2117_v18 = vrot.slane %v2089_v26, %v3027_v16 }
0x2b9f   :  { %v2119_v21 = vcombine.low %v2110_v17, %v2117_v18 }
0x2ba1   :  { %v2133_v25 = vrot.slane %v2119_v21, %v3027_v16 }
0x2ba3   :  { %v2134_v27 = vcombine.low %v2126_v23, %v2133_v25 }
0x2ba5   :  { %2594 = vmatmul.mubr.msk.bf16.vlgmr.msra.gmra.mrb[36].mxu0 %vm325_vm3, %v2134_v27 }
0x2c78   :  { %v2184_v29 = vpop.f32.mrb[36].mxu0 }
0x2c79   :  { %v2185_v30 = vadd.f32 %v2386_v28, %v2184_v29  ;;  %v2595_v33 = vpop.f32.mrb[37].mxu0 }
0x2c7a   :  { %v2187_v4 = vpop.f32.mrb[38].mxu0 }
0x2c7b   :  { %v2193_v35 = vcombine.high %v2185_v30, %v2185_v30  ;;  %v2200_v32 = vrot.slane %v2185_v30, %v3255_v63  ;;  %v2188_v42 = vadd.f32 %v2386_v28, %v2187_v4  ;;  %v2596_v16 = vpop.f32.mrb[39].mxu0 }
0x2c7d   :  { %v2207_v36 = vrot.slane %v2193_v35, %v3255_v63  ;;  %v2208_v31 = vcombine.high %v2200_v32, %v2200_v32  ;;  %v2230_v38 = vrot.slane %v2200_v32, %v2229_v46  ;;  %v2279_v5 = vrot.slane %v2200_v32, %v2278_v34 }
0x2c7e   :  { %v2210_v20 = vcombine.high %v2188_v42, %v2188_v42  ;;  %v2217_v14 = vrot.slane %v2188_v42, %v3255_v63 }
0x2c7f   :  { %v2209_v39 = vcombine.high %v2207_v36, %v2207_v36  ;;  %v2234_v40 = vrot.slane %v2208_v31, %v2229_v46  ;;  %v2238_v41 = vrot.slane %v2207_v36, %v2229_v46  ;;  %v2283_v43 = vrot.slane %v2208_v31, %v2278_v34 }
0x2c80   :  { %v2287_v22 = vrot.slane %v2207_v36, %v2278_v34  ;;  %v2224_v7 = vrot.slane %v2210_v20, %v3255_v63  ;;  %v2225_v44 = vcombine.high %v2217_v14, %v2217_v14  ;;  %v2246_v53 = vrot.slane %v2217_v14, %v2229_v46 }
0x2c81   :  { %v2242_v45 = vrot.slane %v2209_v39, %v2229_v46  ;;  %v2260_v50 = vsel %vm2259_vm7, %v2234_v40, %v2230_v38  ;;  %v2291_v48 = vrot.slane %v2209_v39, %v2278_v34  ;;  %v2308_v49 = vsel %vm2261_vm8, %v2283_v43, %v2279_v5 }
0x2c82   :  { %v2262_v24 = vsel %vm2261_vm8, %v2238_v41, %v2260_v50  ;;  %v2309_v51 = vsel %vm2263_vm9, %v2287_v22, %v2308_v49  ;;  %v2226_v52 = vcombine.high %v2224_v7, %v2224_v7  ;;  %v2250_v54 = vrot.slane %v2225_v44, %v2229_v46 }
0x2c83   :  { %v2264_v55 = vsel %vm2263_vm9, %v2242_v45, %v2262_v24  ;;  %v2254_v63 = vrot.slane %v2224_v7, %v2229_v46  ;;  %v2295_v56 = vrot.slane %v2217_v14, %v2278_v34  ;;  %v2299_v59 = vrot.slane %v2225_v44, %v2278_v34 }
0x2c84   :  { %v2266_v47 = vsel %vm2265_vm10, %v2246_v53, %v2264_v55  ;;  %v2307_v57 = vrot.slane %v2226_v52, %v2278_v34  ;;  %v2258_v58 = vrot.slane %v2226_v52, %v2229_v46  ;;  %v2310_v11 = vsel %vm2265_vm10, %v2291_v48, %v2309_v51 }
0x2c85   :  { %v2268_v2 = vsel %vm2267_vm11, %v2250_v54, %v2266_v47  ;;  %v2303_v0 = vrot.slane %v2224_v7, %v2278_v34  ;;  %v2311_v60 = vsel %vm2267_vm11, %v2295_v56, %v2310_v11 }
0x2c86   :  { %v2270_v61 = vsel %vm2269_vm12, %v2254_v63, %v2268_v2  ;;  %2320 = vst.msk [vmem:[#allocation13 + $0xf] sm:$0x1] %vm2319_vm15, %v2307_v57  ;;  %v2312_v62 = vsel %vm2269_vm12, %v2299_v59, %v2311_v60 }
0x2c87   :  { %v2272_v6 = vsel %vm2271_vm13, %v2258_v58, %v2270_v61  ;;  %v2313_v1 = vsel %vm2271_vm13, %v2303_v0, %v2312_v62 }
0x2c88   :  { %2275 = vst.msk [vmem:[#allocation13] sm:$0xff] %vm2274_vm14, %v2272_v6 }
0x2c89   :  { %2318 = vst.msk [vmem:[#allocation13 + $0x7] sm:$0xfe] %vm2317_vm0, %v2313_v1 }
0x2c8a   :  { %2816 = shalt.err (!%p2813_p8)
}
0x2c8b   :  { %s2817_s25 = scalar_lea.hbm %s3468_s11, 256 }
0x2c8c   :  { %p2818_p9 = scmp.ne.s32.totalorder %s3468_s11, %s2817_s25  ;;  %p2821_p10 = scmp.lt.u32.totalorder %s2817_s25, %s3468_s11 }
0x2c8e   :  { %p2823_p11 = pnand %p2821_p10, %p2818_p9 }
0x2c90   :  { %2826 = shalt.err (!%p2823_p11)
}
0x2c91   :  { %s2848_s15 = smov 128   ;;  %s2849_s16 = smov 8  }
0x2c92   :  { %2332 = dma.vmem_to_hbm [thread:$0]  %s2327_s26, 256, %s3468_s11, [#allocation7], %s2848_s15, %s2848_s15, %s2849_s16  }
0x2c93   :  { %2833 = dma.done.wait [#allocation7], 256  }
0x2c94   :  { %2834 = vsyncadd [#allocation7], 4294967040 }
0x2c95   :  { %2336 = vsyncpa [#allocation6], 1 }
0x2c96   :  { %2337 = vsyncpa [#allocation9], 1 }
0x2c97   :  { %2338 = vsyncpa [#allocation12], 1 }
0x2c98   :  { %2339 = vsyncpa [#allocation7], 1 }

</bundles_post_ra>
